<compile_context>
chip_gen: v7x
topology: tpu7x:2x2x1
jax: 0.10.0
libtpu: 0.0.40
codegen_flags: <defaults>
</compile_context>

<pallas_src>
import functools
from dataclasses import dataclass

import jax
import jax.numpy as jnp
import numpy as np
from jax.experimental import pallas as pl
from jax.experimental.pallas import tpu as pltpu


@dataclass
class PtConfig:
    dim_z: int = 32
    num_channels: int = 4
    ternary_rank: int = 8
    ternary_factor_scaling: float = 0.125
    regularize_h: float = 2.0
    ternary_initializer_range: float = 0.02
    hard: bool = False
    cpd: bool = False
    dropout_prob_h: float = 0.0
    max_position_embeddings: int = 128
    rope_theta: float = 10000.0


def _pt_head_kernel(*refs, num_channels, batch_tile, inv_reg, has_mask, has_qh):
    """One grid step = `batch_tile` batch elements; channels unrolled inside.

    refs (in order):
      qz_ref:   (TB, S, D)
      w_ref:    (C, 2, D, D)    w[c,0] = M_c = s^2 u_c^T v_c,  w[c,1] = M_c^T
      mask_ref: (TB, 1, S, S)   additive mask, pre-scaled by 1/regularize_h   [optional]
      g_ref:    (TB, S, D)      message_G output
      qh_ref:   (TB, C, S, S)   qh output                                     [optional]
    """
    qz_ref = refs[0]
    w_ref = refs[1]
    mask_ref = refs[2] if has_mask else None
    n_in = 3 if has_mask else 2
    g_ref = refs[n_in]
    qh_ref = refs[n_in + 1] if has_qh else None

    for b in range(batch_tile):                      # static unroll over local batch
        qz = qz_ref[b]                               # (S, D) f32
        qz_s = qz * inv_reg                          # folds 1/regularize_h into F
        g_acc = jnp.zeros(qz.shape, dtype=jnp.float32)

        for c in range(num_channels):                # static unroll, C is small
            m_c = w_ref[c, 0]                        # (D, D)
            mt_c = w_ref[c, 1]                       # (D, D) = M_c^T

            # P_c = qz @ M_c ;  F_c / reg = P_c @ (qz/reg)^T   (NT matmul)
            p_c = jnp.dot(qz, m_c, preferred_element_type=jnp.float32)        # (S, D)
            f = jax.lax.dot_general(p_c, qz_s, (((1,), (1,)), ((), ())),
                                    preferred_element_type=jnp.float32)       # (S, S)
            if has_mask:
                f = f + mask_ref[b, 0]               # mask already * 1/reg
            qh = jax.nn.sigmoid(f)                   # (S, S) f32
            if qh_ref is not None:
                qh_ref[b, c] = qh.astype(qh_ref.dtype)

            # Q_c = qz @ M_c^T ;  G += qh @ Q_c + qh^T @ P_c  (TN via dot_general)
            q_c = jnp.dot(qz, mt_c, preferred_element_type=jnp.float32)       # (S, D)
            g_acc = g_acc + jnp.dot(qh, q_c, preferred_element_type=jnp.float32)
            g_acc = g_acc + jax.lax.dot_general(qh, p_c, (((0,), (0,)), ((), ())),
                                                preferred_element_type=jnp.float32)

        g_ref[b] = g_acc.astype(g_ref.dtype)         # single store per local batch


def _pick_batch_tile(batch, cap=8):
    """Largest divisor of batch <= cap, preferring grid length >= 2 (2-TC v7x)."""
    limit = max(1, min(cap, batch if batch < 2 else batch // 2))
    for tb in range(limit, 0, -1):
        if batch % tb == 0:
            return tb
    return 1


def pt_head_selection(qz, ternary_factor_u, ternary_factor_v, config: PtConfig,
                      dependency_mask=None, output_dependencies=True,
                      batch_tile=None, qh_dtype=None):
    """Pallas implementation of PtHeadSelection.forward (soft path)."""
    B, S, D = qz.shape
    C, R = config.num_channels, config.ternary_rank
    assert D == config.dim_z
    assert ternary_factor_u.shape == (C * R, D)
    assert ternary_factor_v.shape == (C * R, D)

    scaling = float(config.ternary_factor_scaling)
    inv_reg = 1.0 / float(config.regularize_h)

    tb = batch_tile if batch_tile is not None else _pick_batch_tile(B)
    assert B % tb == 0, "batch must be divisible by the batch tile"
    grid = (B // tb,)

    # Host-side (XLA) precompute of per-channel D x D factor products — pure
    # reassociation of the forward math; the rank dimension never enters the
    # kernel.  w[c,0] = M_c = s^2 u_c^T v_c, w[c,1] = M_c^T.
    u = ternary_factor_u.reshape(C, R, D).astype(jnp.float32)
    v = ternary_factor_v.reshape(C, R, D).astype(jnp.float32)
    m = (scaling * scaling) * jnp.einsum('crd,cre->cde', u, v)      # (C, D, D)
    w = jnp.stack([m, jnp.swapaxes(m, 1, 2)], axis=1)               # (C, 2, D, D)

    has_mask = dependency_mask is not None
    inputs = [qz.astype(jnp.float32), w]
    in_specs = [
        pl.BlockSpec((tb, S, D), lambda i: (i, 0, 0)),
        pl.BlockSpec((C, 2, D, D), lambda i: (0, 0, 0, 0)),
    ]
    if has_mask:
        assert dependency_mask.shape == (B, 1, S, S)
        inputs.append(dependency_mask.astype(jnp.float32) * inv_reg)   # pre-scaled
        in_specs.append(pl.BlockSpec((tb, 1, S, S), lambda i: (i, 0, 0, 0)))

    out_shape = [jax.ShapeDtypeStruct((B, S, D), qz.dtype)]            # message_G
    out_specs = [pl.BlockSpec((tb, S, D), lambda i: (i, 0, 0))]
    if output_dependencies:
        out_shape.append(jax.ShapeDtypeStruct(
            (B, C, S, S), qh_dtype if qh_dtype is not None else qz.dtype))
        out_specs.append(pl.BlockSpec((tb, C, S, S), lambda i: (i, 0, 0, 0)))

    kernel = functools.partial(
        _pt_head_kernel, num_channels=C, batch_tile=tb, inv_reg=inv_reg,
        has_mask=has_mask, has_qh=output_dependencies)

    outs = pl.pallas_call(
        kernel,
        out_shape=tuple(out_shape),
        grid_spec=pltpu.PrefetchScalarGridSpec(
            num_scalar_prefetch=0,
            grid=grid,
            in_specs=in_specs,
            out_specs=tuple(out_specs)),
        compiler_params=pltpu.CompilerParams(
            dimension_semantics=("parallel",),
            vmem_limit_bytes=32 * 1024 * 1024),
    )(*inputs)

    if output_dependencies:
        return outs[0], outs[1]
    return outs[0], None


def _reference(qz, u_flat, v_flat, config, mask=None):
    """Pure-JAX reference mirroring the PyTorch forward (soft path)."""
    B, S, D = qz.shape
    C, R = config.num_channels, config.ternary_rank
    scaling = config.ternary_factor_scaling
    qz_u = (qz @ u_flat.T) * scaling                        # (B, S, C*R)
    qz_v = (qz @ v_flat.T) * scaling
    qz_u = qz_u.reshape(B, S, C, R).transpose(0, 2, 1, 3)   # (B, C, S, R)
    qz_v = qz_v.reshape(B, S, C, R).transpose(0, 2, 1, 3)
    F = jnp.einsum('bcsr,bctr->bcst', qz_u, qz_v)           # (B, C, S, S)
    if mask is not None:
        F = F + mask
    qh = jax.nn.sigmoid(F / config.regularize_h)
    qh_v1 = jnp.einsum('bcst,bctr->bcsr', qh, qz_v)
    qh_v2 = jnp.einsum('bcts,bctr->bcsr', qh, qz_u)
    qh_v1 = qh_v1.transpose(0, 2, 1, 3).reshape(B, S, C * R)
    qh_v2 = qh_v2.transpose(0, 2, 1, 3).reshape(B, S, C * R)
    G = (qh_v1 @ u_flat + qh_v2 @ v_flat) * scaling
    return G, qh


if __name__ == "__main__":
    config = PtConfig()
    B, S, D = 4, 16, config.dim_z
    C, R = config.num_channels, config.ternary_rank

    key = jax.random.PRNGKey(0)
    k_qz, k_u, k_v, k_m = jax.random.split(key, 4)

    qz = jax.random.normal(k_qz, (B, S, D), dtype=jnp.float32)
    ternary_factor_u = (jax.random.normal(k_u, (C * R, D), dtype=jnp.float32)
                        * config.ternary_initializer_range)
    ternary_factor_v = (jax.random.normal(k_v, (C * R, D), dtype=jnp.float32)
                        * config.ternary_initializer_range)
    dependency_mask = jnp.where(
        jax.random.uniform(k_m, (B, 1, S, S)) > 0.8, -1e9, 0.0
    ).astype(jnp.float32)

    # 1) full path: message_G + qh, with dependency mask
    message_G, qh = pt_head_selection(
        qz, ternary_factor_u, ternary_factor_v, config,
        dependency_mask=dependency_mask, output_dependencies=True)
    jax.block_until_ready((message_G, qh))

    G_ref, qh_ref = _reference(qz, ternary_factor_u, ternary_factor_v,
                               config, dependency_mask)
    np.testing.assert_allclose(np.asarray(message_G), np.asarray(G_ref),
                               rtol=1e-5, atol=1e-5)
    np.testing.assert_allclose(np.asarray(qh), np.asarray(qh_ref),
                               rtol=1e-5, atol=1e-5)

    # 2) fast path: output_dependencies=False (qh never allocated / written)
    G_nd, qh_nd = pt_head_selection(
        qz, ternary_factor_u, ternary_factor_v, config,
        dependency_mask=dependency_mask, output_dependencies=False)
    jax.block_until_ready(G_nd)
    assert qh_nd is None
    np.testing.assert_allclose(np.asarray(G_nd), np.asarray(G_ref),
                               rtol=1e-5, atol=1e-5)

    # 3) no-mask path (mask input skipped entirely)
    G_nm, qh_nm = pt_head_selection(
        qz, ternary_factor_u, ternary_factor_v, config,
        dependency_mask=None, output_dependencies=True)
    jax.block_until_ready((G_nm, qh_nm))
    G_ref_nm, qh_ref_nm = _reference(qz, ternary_factor_u, ternary_factor_v,
                                     config, None)
    np.testing.assert_allclose(np.asarray(G_nm), np.asarray(G_ref_nm),
                               rtol=1e-5, atol=1e-5)
    np.testing.assert_allclose(np.asarray(qh_nm), np.asarray(qh_ref_nm),
                               rtol=1e-5, atol=1e-5)

    print("KERNEL_OK")
</pallas_src>

<mosaic_0001>
module attributes {stable_mosaic.version = 11 : i64} {
  func.func @_pt_head_kernel(%arg0: i32, %arg1: memref<2x16x32xf32, #tpu.memory_space<vmem>>, %arg2: memref<4x2x32x32xf32, #tpu.memory_space<vmem>>, %arg3: memref<2x1x16x16xf32, #tpu.memory_space<vmem>>, %arg4: memref<2x16x32xf32, #tpu.memory_space<vmem>>, %arg5: memref<2x4x16x16xf32, #tpu.memory_space<vmem>>) attributes {dimension_semantics = [#tpu.dimension_semantics<parallel>], iteration_bounds = array<i64: 2>, scalar_prefetch = 0 : i64, scratch_operands = 0 : i64, tpu.core_type = #tpu.core_type<tc>, window_params = [{transform_indices = @transform_0, window_bounds = array<i64: 2, 16, 32>}, {pipeline_mode = #tpu.pipeline_mode<synchronous>, transform_indices = @transform_1, window_bounds = array<i64: 4, 2, 32, 32>}, {transform_indices = @transform_2, window_bounds = array<i64: 2, 1, 16, 16>}, {transform_indices = @transform_3, window_bounds = array<i64: 2, 16, 32>}, {transform_indices = @transform_4, window_bounds = array<i64: 2, 4, 16, 16>}]} {
    %c0 = arith.constant 0 : index
    %c0_0 = arith.constant 0 : index
    %c0_1 = arith.constant 0 : index
    %0 = vector.load %arg1[%c0, %c0_0, %c0_1] : memref<2x16x32xf32, #tpu.memory_space<vmem>>, vector<1x16x32xf32>
    %1 = vector.shape_cast %0 : vector<1x16x32xf32> to vector<16x32xf32>
    %cst = arith.constant 5.000000e-01 : f32
    %2 = vector.broadcast %cst : f32 to vector<16x32xf32>
    %3 = arith.mulf %1, %2 : vector<16x32xf32>
    %cst_2 = arith.constant 0.000000e+00 : f32
    %4 = vector.broadcast %cst_2 : f32 to vector<16x32xf32>
    %c0_3 = arith.constant 0 : index
    %c0_4 = arith.constant 0 : index
    %c0_5 = arith.constant 0 : index
    %c0_6 = arith.constant 0 : index
    %5 = vector.load %arg2[%c0_3, %c0_4, %c0_5, %c0_6] : memref<4x2x32x32xf32, #tpu.memory_space<vmem>>, vector<1x1x32x32xf32>
    %6 = vector.shape_cast %5 : vector<1x1x32x32xf32> to vector<32x32xf32>
    %c0_7 = arith.constant 0 : index
    %c1 = arith.constant 1 : index
    %c0_8 = arith.constant 0 : index
    %c0_9 = arith.constant 0 : index
    %7 = vector.load %arg2[%c0_7, %c1, %c0_8, %c0_9] : memref<4x2x32x32xf32, #tpu.memory_space<vmem>>, vector<1x1x32x32xf32>
    %8 = vector.shape_cast %7 : vector<1x1x32x32xf32> to vector<32x32xf32>
    %cst_10 = arith.constant dense<0.000000e+00> : vector<16x32xf32>
    %9 = tpu.matmul %1, %6, %cst_10 {dimension_numbers = #tpu.dot_dimension_numbers<[1], [0], [0], [1], [0, 0, 1, 1], [], []>} : vector<16x32xf32>, vector<32x32xf32>, vector<16x32xf32> -> vector<16x32xf32>
    %cst_11 = arith.constant dense<0.000000e+00> : vector<16x16xf32>
    %10 = tpu.matmul %9, %3, %cst_11 {dimension_numbers = #tpu.dot_dimension_numbers<[1], [1], [0], [0], [0, 0, 1, 0], [], []>} : vector<16x32xf32>, vector<16x32xf32>, vector<16x16xf32> -> vector<16x16xf32>
    %c0_12 = arith.constant 0 : index
    %c0_13 = arith.constant 0 : index
    %c0_14 = arith.constant 0 : index
    %c0_15 = arith.constant 0 : index
    %11 = vector.load %arg3[%c0_12, %c0_13, %c0_14, %c0_15] : memref<2x1x16x16xf32, #tpu.memory_space<vmem>>, vector<1x1x16x16xf32>
    %12 = vector.shape_cast %11 : vector<1x1x16x16xf32> to vector<16x16xf32>
    %13 = arith.addf %10, %12 : vector<16x16xf32>
    %14 = arith.negf %13 : vector<16x16xf32>
    %15 = math.exp %14 : vector<16x16xf32>
    %cst_16 = arith.constant 1.000000e+00 : f32
    %16 = vector.broadcast %cst_16 : f32 to vector<16x16xf32>
    %17 = arith.addf %16, %15 : vector<16x16xf32>
    %18 = arith.divf %16, %17 : vector<16x16xf32>
    %c0_17 = arith.constant 0 : index
    %c0_18 = arith.constant 0 : index
    %c0_19 = arith.constant 0 : index
    %c0_20 = arith.constant 0 : index
    %19 = vector.load %arg5[%c0_17, %c0_18, %c0_19, %c0_20] : memref<2x4x16x16xf32, #tpu.memory_space<vmem>>, vector<1x1x16x16xf32>
    %20 = vector.shape_cast %19 : vector<1x1x16x16xf32> to vector<16x16xf32>
    %21 = vector.shape_cast %18 : vector<16x16xf32> to vector<1x1x16x16xf32>
    tpu.vector_store %arg5[%c0_17, %c0_18, %c0_19, %c0_20], %21 {strides = array<i32>} : memref<2x4x16x16xf32, #tpu.memory_space<vmem>>, vector<1x1x16x16xf32>,
    %cst_21 = arith.constant dense<0.000000e+00> : vector<16x32xf32>
    %22 = tpu.matmul %1, %8, %cst_21 {dimension_numbers = #tpu.dot_dimension_numbers<[1], [0], [0], [1], [0, 0, 1, 1], [], []>} : vector<16x32xf32>, vector<32x32xf32>, vector<16x32xf32> -> vector<16x32xf32>
    %cst_22 = arith.constant dense<0.000000e+00> : vector<16x32xf32>
    %23 = tpu.matmul %18, %22, %cst_22 {dimension_numbers = #tpu.dot_dimension_numbers<[1], [0], [0], [1], [0, 0, 1, 1], [], []>} : vector<16x16xf32>, vector<16x32xf32>, vector<16x32xf32> -> vector<16x32xf32>
    %24 = arith.addf %4, %23 : vector<16x32xf32>
    %cst_23 = arith.constant dense<0.000000e+00> : vector<16x32xf32>
    %25 = tpu.matmul %18, %9, %cst_23 {dimension_numbers = #tpu.dot_dimension_numbers<[0], [0], [1], [1], [0, 1, 1, 1], [], []>} : vector<16x16xf32>, vector<16x32xf32>, vector<16x32xf32> -> vector<16x32xf32>
    %26 = arith.addf %24, %25 : vector<16x32xf32>
    %c1_24 = arith.constant 1 : index
    %c0_25 = arith.constant 0 : index
    %c0_26 = arith.constant 0 : index
    %c0_27 = arith.constant 0 : index
    %27 = vector.load %arg2[%c1_24, %c0_25, %c0_26, %c0_27] : memref<4x2x32x32xf32, #tpu.memory_space<vmem>>, vector<1x1x32x32xf32>
    %28 = vector.shape_cast %27 : vector<1x1x32x32xf32> to vector<32x32xf32>
    %c1_28 = arith.constant 1 : index
    %c1_29 = arith.constant 1 : index
    %c0_30 = arith.constant 0 : index
    %c0_31 = arith.constant 0 : index
    %29 = vector.load %arg2[%c1_28, %c1_29, %c0_30, %c0_31] : memref<4x2x32x32xf32, #tpu.memory_space<vmem>>, vector<1x1x32x32xf32>
    %30 = vector.shape_cast %29 : vector<1x1x32x32xf32> to vector<32x32xf32>
    %cst_32 = arith.constant dense<0.000000e+00> : vector<16x32xf32>
    %31 = tpu.matmul %1, %28, %cst_32 {dimension_numbers = #tpu.dot_dimension_numbers<[1], [0], [0], [1], [0, 0, 1, 1], [], []>} : vector<16x32xf32>, vector<32x32xf32>, vector<16x32xf32> -> vector<16x32xf32>
    %cst_33 = arith.constant dense<0.000000e+00> : vector<16x16xf32>
    %32 = tpu.matmul %31, %3, %cst_33 {dimension_numbers = #tpu.dot_dimension_numbers<[1], [1], [0], [0], [0, 0, 1, 0], [], []>} : vector<16x32xf32>, vector<16x32xf32>, vector<16x16xf32> -> vector<16x16xf32>
    %c0_34 = arith.constant 0 : index
    %c0_35 = arith.constant 0 : index
    %c0_36 = arith.constant 0 : index
    %c0_37 = arith.constant 0 : index
    %33 = vector.load %arg3[%c0_34, %c0_35, %c0_36, %c0_37] : memref<2x1x16x16xf32, #tpu.memory_space<vmem>>, vector<1x1x16x16xf32>
    %34 = vector.shape_cast %33 : vector<1x1x16x16xf32> to vector<16x16xf32>
    %35 = arith.addf %32, %34 : vector<16x16xf32>
    %36 = arith.negf %35 : vector<16x16xf32>
    %37 = math.exp %36 : vector<16x16xf32>
    %cst_38 = arith.constant 1.000000e+00 : f32
    %38 = vector.broadcast %cst_38 : f32 to vector<16x16xf32>
    %39 = arith.addf %38, %37 : vector<16x16xf32>
    %40 = arith.divf %38, %39 : vector<16x16xf32>
    %c0_39 = arith.constant 0 : index
    %c1_40 = arith.constant 1 : index
    %c0_41 = arith.constant 0 : index
    %c0_42 = arith.constant 0 : index
    %41 = vector.load %arg5[%c0_39, %c1_40, %c0_41, %c0_42] : memref<2x4x16x16xf32, #tpu.memory_space<vmem>>, vector<1x1x16x16xf32>
    %42 = vector.shape_cast %41 : vector<1x1x16x16xf32> to vector<16x16xf32>
    %43 = vector.shape_cast %40 : vector<16x16xf32> to vector<1x1x16x16xf32>
    tpu.vector_store %arg5[%c0_39, %c1_40, %c0_41, %c0_42], %43 {strides = array<i32>} : memref<2x4x16x16xf32, #tpu.memory_space<vmem>>, vector<1x1x16x16xf32>,
    %cst_43 = arith.constant dense<0.000000e+00> : vector<16x32xf32>
    %44 = tpu.matmul %1, %30, %cst_43 {dimension_numbers = #tpu.dot_dimension_numbers<[1], [0], [0], [1], [0, 0, 1, 1], [], []>} : vector<16x32xf32>, vector<32x32xf32>, vector<16x32xf32> -> vector<16x32xf32>
    %cst_44 = arith.constant dense<0.000000e+00> : vector<16x32xf32>
    %45 = tpu.matmul %40, %44, %cst_44 {dimension_numbers = #tpu.dot_dimension_numbers<[1], [0], [0], [1], [0, 0, 1, 1], [], []>} : vector<16x16xf32>, vector<16x32xf32>, vector<16x32xf32> -> vector<16x32xf32>
    %46 = arith.addf %26, %45 : vector<16x32xf32>
    %cst_45 = arith.constant dense<0.000000e+00> : vector<16x32xf32>
    %47 = tpu.matmul %40, %31, %cst_45 {dimension_numbers = #tpu.dot_dimension_numbers<[0], [0], [1], [1], [0, 1, 1, 1], [], []>} : vector<16x16xf32>, vector<16x32xf32>, vector<16x32xf32> -> vector<16x32xf32>
    %48 = arith.addf %46, %47 : vector<16x32xf32>
    %c2 = arith.constant 2 : index
    %c0_46 = arith.constant 0 : index
    %c0_47 = arith.constant 0 : index
    %c0_48 = arith.constant 0 : index
    %49 = vector.load %arg2[%c2, %c0_46, %c0_47, %c0_48] : memref<4x2x32x32xf32, #tpu.memory_space<vmem>>, vector<1x1x32x32xf32>
    %50 = vector.shape_cast %49 : vector<1x1x32x32xf32> to vector<32x32xf32>
    %c2_49 = arith.constant 2 : index
    %c1_50 = arith.constant 1 : index
    %c0_51 = arith.constant 0 : index
    %c0_52 = arith.constant 0 : index
    %51 = vector.load %arg2[%c2_49, %c1_50, %c0_51, %c0_52] : memref<4x2x32x32xf32, #tpu.memory_space<vmem>>, vector<1x1x32x32xf32>
    %52 = vector.shape_cast %51 : vector<1x1x32x32xf32> to vector<32x32xf32>
    %cst_53 = arith.constant dense<0.000000e+00> : vector<16x32xf32>
    %53 = tpu.matmul %1, %50, %cst_53 {dimension_numbers = #tpu.dot_dimension_numbers<[1], [0], [0], [1], [0, 0, 1, 1], [], []>} : vector<16x32xf32>, vector<32x32xf32>, vector<16x32xf32> -> vector<16x32xf32>
    %cst_54 = arith.constant dense<0.000000e+00> : vector<16x16xf32>
    %54 = tpu.matmul %53, %3, %cst_54 {dimension_numbers = #tpu.dot_dimension_numbers<[1], [1], [0], [0], [0, 0, 1, 0], [], []>} : vector<16x32xf32>, vector<16x32xf32>, vector<16x16xf32> -> vector<16x16xf32>
    %c0_55 = arith.constant 0 : index
    %c0_56 = arith.constant 0 : index
    %c0_57 = arith.constant 0 : index
    %c0_58 = arith.constant 0 : index
    %55 = vector.load %arg3[%c0_55, %c0_56, %c0_57, %c0_58] : memref<2x1x16x16xf32, #tpu.memory_space<vmem>>, vector<1x1x16x16xf32>
    %56 = vector.shape_cast %55 : vector<1x1x16x16xf32> to vector<16x16xf32>
    %57 = arith.addf %54, %56 : vector<16x16xf32>
    %58 = arith.negf %57 : vector<16x16xf32>
    %59 = math.exp %58 : vector<16x16xf32>
    %cst_59 = arith.constant 1.000000e+00 : f32
    %60 = vector.broadcast %cst_59 : f32 to vector<16x16xf32>
    %61 = arith.addf %60, %59 : vector<16x16xf32>
    %62 = arith.divf %60, %61 : vector<16x16xf32>
    %c0_60 = arith.constant 0 : index
    %c2_61 = arith.constant 2 : index
    %c0_62 = arith.constant 0 : index
    %c0_63 = arith.constant 0 : index
    %63 = vector.load %arg5[%c0_60, %c2_61, %c0_62, %c0_63] : memref<2x4x16x16xf32, #tpu.memory_space<vmem>>, vector<1x1x16x16xf32>
    %64 = vector.shape_cast %63 : vector<1x1x16x16xf32> to vector<16x16xf32>
    %65 = vector.shape_cast %62 : vector<16x16xf32> to vector<1x1x16x16xf32>
    tpu.vector_store %arg5[%c0_60, %c2_61, %c0_62, %c0_63], %65 {strides = array<i32>} : memref<2x4x16x16xf32, #tpu.memory_space<vmem>>, vector<1x1x16x16xf32>,
    %cst_64 = arith.constant dense<0.000000e+00> : vector<16x32xf32>
    %66 = tpu.matmul %1, %52, %cst_64 {dimension_numbers = #tpu.dot_dimension_numbers<[1], [0], [0], [1], [0, 0, 1, 1], [], []>} : vector<16x32xf32>, vector<32x32xf32>, vector<16x32xf32> -> vector<16x32xf32>
    %cst_65 = arith.constant dense<0.000000e+00> : vector<16x32xf32>
    %67 = tpu.matmul %62, %66, %cst_65 {dimension_numbers = #tpu.dot_dimension_numbers<[1], [0], [0], [1], [0, 0, 1, 1], [], []>} : vector<16x16xf32>, vector<16x32xf32>, vector<16x32xf32> -> vector<16x32xf32>
    %68 = arith.addf %48, %67 : vector<16x32xf32>
    %cst_66 = arith.constant dense<0.000000e+00> : vector<16x32xf32>
    %69 = tpu.matmul %62, %53, %cst_66 {dimension_numbers = #tpu.dot_dimension_numbers<[0], [0], [1], [1], [0, 1, 1, 1], [], []>} : vector<16x16xf32>, vector<16x32xf32>, vector<16x32xf32> -> vector<16x32xf32>
    %70 = arith.addf %68, %69 : vector<16x32xf32>
    %c3 = arith.constant 3 : index
    %c0_67 = arith.constant 0 : index
    %c0_68 = arith.constant 0 : index
    %c0_69 = arith.constant 0 : index
    %71 = vector.load %arg2[%c3, %c0_67, %c0_68, %c0_69] : memref<4x2x32x32xf32, #tpu.memory_space<vmem>>, vector<1x1x32x32xf32>
    %72 = vector.shape_cast %71 : vector<1x1x32x32xf32> to vector<32x32xf32>
    %c3_70 = arith.constant 3 : index
    %c1_71 = arith.constant 1 : index
    %c0_72 = arith.constant 0 : index
    %c0_73 = arith.constant 0 : index
    %73 = vector.load %arg2[%c3_70, %c1_71, %c0_72, %c0_73] : memref<4x2x32x32xf32, #tpu.memory_space<vmem>>, vector<1x1x32x32xf32>
    %74 = vector.shape_cast %73 : vector<1x1x32x32xf32> to vector<32x32xf32>
    %cst_74 = arith.constant dense<0.000000e+00> : vector<16x32xf32>
    %75 = tpu.matmul %1, %72, %cst_74 {dimension_numbers = #tpu.dot_dimension_numbers<[1], [0], [0], [1], [0, 0, 1, 1], [], []>} : vector<16x32xf32>, vector<32x32xf32>, vector<16x32xf32> -> vector<16x32xf32>
    %cst_75 = arith.constant dense<0.000000e+00> : vector<16x16xf32>
    %76 = tpu.matmul %75, %3, %cst_75 {dimension_numbers = #tpu.dot_dimension_numbers<[1], [1], [0], [0], [0, 0, 1, 0], [], []>} : vector<16x32xf32>, vector<16x32xf32>, vector<16x16xf32> -> vector<16x16xf32>
    %c0_76 = arith.constant 0 : index
    %c0_77 = arith.constant 0 : index
    %c0_78 = arith.constant 0 : index
    %c0_79 = arith.constant 0 : index
    %77 = vector.load %arg3[%c0_76, %c0_77, %c0_78, %c0_79] : memref<2x1x16x16xf32, #tpu.memory_space<vmem>>, vector<1x1x16x16xf32>
    %78 = vector.shape_cast %77 : vector<1x1x16x16xf32> to vector<16x16xf32>
    %79 = arith.addf %76, %78 : vector<16x16xf32>
    %80 = arith.negf %79 : vector<16x16xf32>
    %81 = math.exp %80 : vector<16x16xf32>
    %cst_80 = arith.constant 1.000000e+00 : f32
    %82 = vector.broadcast %cst_80 : f32 to vector<16x16xf32>
    %83 = arith.addf %82, %81 : vector<16x16xf32>
    %84 = arith.divf %82, %83 : vector<16x16xf32>
    %c0_81 = arith.constant 0 : index
    %c3_82 = arith.constant 3 : index
    %c0_83 = arith.constant 0 : index
    %c0_84 = arith.constant 0 : index
    %85 = vector.load %arg5[%c0_81, %c3_82, %c0_83, %c0_84] : memref<2x4x16x16xf32, #tpu.memory_space<vmem>>, vector<1x1x16x16xf32>
    %86 = vector.shape_cast %85 : vector<1x1x16x16xf32> to vector<16x16xf32>
    %87 = vector.shape_cast %84 : vector<16x16xf32> to vector<1x1x16x16xf32>
    tpu.vector_store %arg5[%c0_81, %c3_82, %c0_83, %c0_84], %87 {strides = array<i32>} : memref<2x4x16x16xf32, #tpu.memory_space<vmem>>, vector<1x1x16x16xf32>,
    %cst_85 = arith.constant dense<0.000000e+00> : vector<16x32xf32>
    %88 = tpu.matmul %1, %74, %cst_85 {dimension_numbers = #tpu.dot_dimension_numbers<[1], [0], [0], [1], [0, 0, 1, 1], [], []>} : vector<16x32xf32>, vector<32x32xf32>, vector<16x32xf32> -> vector<16x32xf32>
    %cst_86 = arith.constant dense<0.000000e+00> : vector<16x32xf32>
    %89 = tpu.matmul %84, %88, %cst_86 {dimension_numbers = #tpu.dot_dimension_numbers<[1], [0], [0], [1], [0, 0, 1, 1], [], []>} : vector<16x16xf32>, vector<16x32xf32>, vector<16x32xf32> -> vector<16x32xf32>
    %90 = arith.addf %70, %89 : vector<16x32xf32>
    %cst_87 = arith.constant dense<0.000000e+00> : vector<16x32xf32>
    %91 = tpu.matmul %84, %75, %cst_87 {dimension_numbers = #tpu.dot_dimension_numbers<[0], [0], [1], [1], [0, 1, 1, 1], [], []>} : vector<16x16xf32>, vector<16x32xf32>, vector<16x32xf32> -> vector<16x32xf32>
    %92 = arith.addf %90, %91 : vector<16x32xf32>
    %c0_88 = arith.constant 0 : index
    %c0_89 = arith.constant 0 : index
    %c0_90 = arith.constant 0 : index
    %93 = vector.load %arg4[%c0_88, %c0_89, %c0_90] : memref<2x16x32xf32, #tpu.memory_space<vmem>>, vector<1x16x32xf32>
    %94 = vector.shape_cast %93 : vector<1x16x32xf32> to vector<16x32xf32>
    %95 = vector.shape_cast %92 : vector<16x32xf32> to vector<1x16x32xf32>
    tpu.vector_store %arg4[%c0_88, %c0_89, %c0_90], %95 {strides = array<i32>} : memref<2x16x32xf32, #tpu.memory_space<vmem>>, vector<1x16x32xf32>,
    %c1_91 = arith.constant 1 : index
    %c0_92 = arith.constant 0 : index
    %c0_93 = arith.constant 0 : index
    %96 = vector.load %arg1[%c1_91, %c0_92, %c0_93] : memref<2x16x32xf32, #tpu.memory_space<vmem>>, vector<1x16x32xf32>
    %97 = vector.shape_cast %96 : vector<1x16x32xf32> to vector<16x32xf32>
    %cst_94 = arith.constant 5.000000e-01 : f32
    %98 = vector.broadcast %cst_94 : f32 to vector<16x32xf32>
    %99 = arith.mulf %97, %98 : vector<16x32xf32>
    %cst_95 = arith.constant 0.000000e+00 : f32
    %100 = vector.broadcast %cst_95 : f32 to vector<16x32xf32>
    %c0_96 = arith.constant 0 : index
    %c0_97 = arith.constant 0 : index
    %c0_98 = arith.constant 0 : index
    %c0_99 = arith.constant 0 : index
    %101 = vector.load %arg2[%c0_96, %c0_97, %c0_98, %c0_99] : memref<4x2x32x32xf32, #tpu.memory_space<vmem>>, vector<1x1x32x32xf32>
    %102 = vector.shape_cast %101 : vector<1x1x32x32xf32> to vector<32x32xf32>
    %c0_100 = arith.constant 0 : index
    %c1_101 = arith.constant 1 : index
    %c0_102 = arith.constant 0 : index
    %c0_103 = arith.constant 0 : index
    %103 = vector.load %arg2[%c0_100, %c1_101, %c0_102, %c0_103] : memref<4x2x32x32xf32, #tpu.memory_space<vmem>>, vector<1x1x32x32xf32>
    %104 = vector.shape_cast %103 : vector<1x1x32x32xf32> to vector<32x32xf32>
    %cst_104 = arith.constant dense<0.000000e+00> : vector<16x32xf32>
    %105 = tpu.matmul %97, %102, %cst_104 {dimension_numbers = #tpu.dot_dimension_numbers<[1], [0], [0], [1], [0, 0, 1, 1], [], []>} : vector<16x32xf32>, vector<32x32xf32>, vector<16x32xf32> -> vector<16x32xf32>
    %cst_105 = arith.constant dense<0.000000e+00> : vector<16x16xf32>
    %106 = tpu.matmul %105, %99, %cst_105 {dimension_numbers = #tpu.dot_dimension_numbers<[1], [1], [0], [0], [0, 0, 1, 0], [], []>} : vector<16x32xf32>, vector<16x32xf32>, vector<16x16xf32> -> vector<16x16xf32>
    %c1_106 = arith.constant 1 : index
    %c0_107 = arith.constant 0 : index
    %c0_108 = arith.constant 0 : index
    %c0_109 = arith.constant 0 : index
    %107 = vector.load %arg3[%c1_106, %c0_107, %c0_108, %c0_109] : memref<2x1x16x16xf32, #tpu.memory_space<vmem>>, vector<1x1x16x16xf32>
    %108 = vector.shape_cast %107 : vector<1x1x16x16xf32> to vector<16x16xf32>
    %109 = arith.addf %106, %108 : vector<16x16xf32>
    %110 = arith.negf %109 : vector<16x16xf32>
    %111 = math.exp %110 : vector<16x16xf32>
    %cst_110 = arith.constant 1.000000e+00 : f32
    %112 = vector.broadcast %cst_110 : f32 to vector<16x16xf32>
    %113 = arith.addf %112, %111 : vector<16x16xf32>
    %114 = arith.divf %112, %113 : vector<16x16xf32>
    %c1_111 = arith.constant 1 : index
    %c0_112 = arith.constant 0 : index
    %c0_113 = arith.constant 0 : index
    %c0_114 = arith.constant 0 : index
    %115 = vector.load %arg5[%c1_111, %c0_112, %c0_113, %c0_114] : memref<2x4x16x16xf32, #tpu.memory_space<vmem>>, vector<1x1x16x16xf32>
    %116 = vector.shape_cast %115 : vector<1x1x16x16xf32> to vector<16x16xf32>
    %117 = vector.shape_cast %114 : vector<16x16xf32> to vector<1x1x16x16xf32>
    tpu.vector_store %arg5[%c1_111, %c0_112, %c0_113, %c0_114], %117 {strides = array<i32>} : memref<2x4x16x16xf32, #tpu.memory_space<vmem>>, vector<1x1x16x16xf32>,
    %cst_115 = arith.constant dense<0.000000e+00> : vector<16x32xf32>
    %118 = tpu.matmul %97, %104, %cst_115 {dimension_numbers = #tpu.dot_dimension_numbers<[1], [0], [0], [1], [0, 0, 1, 1], [], []>} : vector<16x32xf32>, vector<32x32xf32>, vector<16x32xf32> -> vector<16x32xf32>
    %cst_116 = arith.constant dense<0.000000e+00> : vector<16x32xf32>
    %119 = tpu.matmul %114, %118, %cst_116 {dimension_numbers = #tpu.dot_dimension_numbers<[1], [0], [0], [1], [0, 0, 1, 1], [], []>} : vector<16x16xf32>, vector<16x32xf32>, vector<16x32xf32> -> vector<16x32xf32>
    %120 = arith.addf %100, %119 : vector<16x32xf32>
    %cst_117 = arith.constant dense<0.000000e+00> : vector<16x32xf32>
    %121 = tpu.matmul %114, %105, %cst_117 {dimension_numbers = #tpu.dot_dimension_numbers<[0], [0], [1], [1], [0, 1, 1, 1], [], []>} : vector<16x16xf32>, vector<16x32xf32>, vector<16x32xf32> -> vector<16x32xf32>
    %122 = arith.addf %120, %121 : vector<16x32xf32>
    %c1_118 = arith.constant 1 : index
    %c0_119 = arith.constant 0 : index
    %c0_120 = arith.constant 0 : index
    %c0_121 = arith.constant 0 : index
    %123 = vector.load %arg2[%c1_118, %c0_119, %c0_120, %c0_121] : memref<4x2x32x32xf32, #tpu.memory_space<vmem>>, vector<1x1x32x32xf32>
    %124 = vector.shape_cast %123 : vector<1x1x32x32xf32> to vector<32x32xf32>
    %c1_122 = arith.constant 1 : index
    %c1_123 = arith.constant 1 : index
    %c0_124 = arith.constant 0 : index
    %c0_125 = arith.constant 0 : index
    %125 = vector.load %arg2[%c1_122, %c1_123, %c0_124, %c0_125] : memref<4x2x32x32xf32, #tpu.memory_space<vmem>>, vector<1x1x32x32xf32>
    %126 = vector.shape_cast %125 : vector<1x1x32x32xf32> to vector<32x32xf32>
    %cst_126 = arith.constant dense<0.000000e+00> : vector<16x32xf32>
    %127 = tpu.matmul %97, %124, %cst_126 {dimension_numbers = #tpu.dot_dimension_numbers<[1], [0], [0], [1], [0, 0, 1, 1], [], []>} : vector<16x32xf32>, vector<32x32xf32>, vector<16x32xf32> -> vector<16x32xf32>
    %cst_127 = arith.constant dense<0.000000e+00> : vector<16x16xf32>
    %128 = tpu.matmul %127, %99, %cst_127 {dimension_numbers = #tpu.dot_dimension_numbers<[1], [1], [0], [0], [0, 0, 1, 0], [], []>} : vector<16x32xf32>, vector<16x32xf32>, vector<16x16xf32> -> vector<16x16xf32>
    %c1_128 = arith.constant 1 : index
    %c0_129 = arith.constant 0 : index
    %c0_130 = arith.constant 0 : index
    %c0_131 = arith.constant 0 : index
    %129 = vector.load %arg3[%c1_128, %c0_129, %c0_130, %c0_131] : memref<2x1x16x16xf32, #tpu.memory_space<vmem>>, vector<1x1x16x16xf32>
    %130 = vector.shape_cast %129 : vector<1x1x16x16xf32> to vector<16x16xf32>
    %131 = arith.addf %128, %130 : vector<16x16xf32>
    %132 = arith.negf %131 : vector<16x16xf32>
    %133 = math.exp %132 : vector<16x16xf32>
    %cst_132 = arith.constant 1.000000e+00 : f32
    %134 = vector.broadcast %cst_132 : f32 to vector<16x16xf32>
    %135 = arith.addf %134, %133 : vector<16x16xf32>
    %136 = arith.divf %134, %135 : vector<16x16xf32>
    %c1_133 = arith.constant 1 : index
    %c1_134 = arith.constant 1 : index
    %c0_135 = arith.constant 0 : index
    %c0_136 = arith.constant 0 : index
    %137 = vector.load %arg5[%c1_133, %c1_134, %c0_135, %c0_136] : memref<2x4x16x16xf32, #tpu.memory_space<vmem>>, vector<1x1x16x16xf32>
    %138 = vector.shape_cast %137 : vector<1x1x16x16xf32> to vector<16x16xf32>
    %139 = vector.shape_cast %136 : vector<16x16xf32> to vector<1x1x16x16xf32>
    tpu.vector_store %arg5[%c1_133, %c1_134, %c0_135, %c0_136], %139 {strides = array<i32>} : memref<2x4x16x16xf32, #tpu.memory_space<vmem>>, vector<1x1x16x16xf32>,
    %cst_137 = arith.constant dense<0.000000e+00> : vector<16x32xf32>
    %140 = tpu.matmul %97, %126, %cst_137 {dimension_numbers = #tpu.dot_dimension_numbers<[1], [0], [0], [1], [0, 0, 1, 1], [], []>} : vector<16x32xf32>, vector<32x32xf32>, vector<16x32xf32> -> vector<16x32xf32>
    %cst_138 = arith.constant dense<0.000000e+00> : vector<16x32xf32>
    %141 = tpu.matmul %136, %140, %cst_138 {dimension_numbers = #tpu.dot_dimension_numbers<[1], [0], [0], [1], [0, 0, 1, 1], [], []>} : vector<16x16xf32>, vector<16x32xf32>, vector<16x32xf32> -> vector<16x32xf32>
    %142 = arith.addf %122, %141 : vector<16x32xf32>
    %cst_139 = arith.constant dense<0.000000e+00> : vector<16x32xf32>
    %143 = tpu.matmul %136, %127, %cst_139 {dimension_numbers = #tpu.dot_dimension_numbers<[0], [0], [1], [1], [0, 1, 1, 1], [], []>} : vector<16x16xf32>, vector<16x32xf32>, vector<16x32xf32> -> vector<16x32xf32>
    %144 = arith.addf %142, %143 : vector<16x32xf32>
    %c2_140 = arith.constant 2 : index
    %c0_141 = arith.constant 0 : index
    %c0_142 = arith.constant 0 : index
    %c0_143 = arith.constant 0 : index
    %145 = vector.load %arg2[%c2_140, %c0_141, %c0_142, %c0_143] : memref<4x2x32x32xf32, #tpu.memory_space<vmem>>, vector<1x1x32x32xf32>
    %146 = vector.shape_cast %145 : vector<1x1x32x32xf32> to vector<32x32xf32>
    %c2_144 = arith.constant 2 : index
    %c1_145 = arith.constant 1 : index
    %c0_146 = arith.constant 0 : index
    %c0_147 = arith.constant 0 : index
    %147 = vector.load %arg2[%c2_144, %c1_145, %c0_146, %c0_147] : memref<4x2x32x32xf32, #tpu.memory_space<vmem>>, vector<1x1x32x32xf32>
    %148 = vector.shape_cast %147 : vector<1x1x32x32xf32> to vector<32x32xf32>
    %cst_148 = arith.constant dense<0.000000e+00> : vector<16x32xf32>
    %149 = tpu.matmul %97, %146, %cst_148 {dimension_numbers = #tpu.dot_dimension_numbers<[1], [0], [0], [1], [0, 0, 1, 1], [], []>} : vector<16x32xf32>, vector<32x32xf32>, vector<16x32xf32> -> vector<16x32xf32>
    %cst_149 = arith.constant dense<0.000000e+00> : vector<16x16xf32>
    %150 = tpu.matmul %149, %99, %cst_149 {dimension_numbers = #tpu.dot_dimension_numbers<[1], [1], [0], [0], [0, 0, 1, 0], [], []>} : vector<16x32xf32>, vector<16x32xf32>, vector<16x16xf32> -> vector<16x16xf32>
    %c1_150 = arith.constant 1 : index
    %c0_151 = arith.constant 0 : index
    %c0_152 = arith.constant 0 : index
    %c0_153 = arith.constant 0 : index
    %151 = vector.load %arg3[%c1_150, %c0_151, %c0_152, %c0_153] : memref<2x1x16x16xf32, #tpu.memory_space<vmem>>, vector<1x1x16x16xf32>
    %152 = vector.shape_cast %151 : vector<1x1x16x16xf32> to vector<16x16xf32>
    %153 = arith.addf %150, %152 : vector<16x16xf32>
    %154 = arith.negf %153 : vector<16x16xf32>
    %155 = math.exp %154 : vector<16x16xf32>
    %cst_154 = arith.constant 1.000000e+00 : f32
    %156 = vector.broadcast %cst_154 : f32 to vector<16x16xf32>
    %157 = arith.addf %156, %155 : vector<16x16xf32>
    %158 = arith.divf %156, %157 : vector<16x16xf32>
    %c1_155 = arith.constant 1 : index
    %c2_156 = arith.constant 2 : index
    %c0_157 = arith.constant 0 : index
    %c0_158 = arith.constant 0 : index
    %159 = vector.load %arg5[%c1_155, %c2_156, %c0_157, %c0_158] : memref<2x4x16x16xf32, #tpu.memory_space<vmem>>, vector<1x1x16x16xf32>
    %160 = vector.shape_cast %159 : vector<1x1x16x16xf32> to vector<16x16xf32>
    %161 = vector.shape_cast %158 : vector<16x16xf32> to vector<1x1x16x16xf32>
    tpu.vector_store %arg5[%c1_155, %c2_156, %c0_157, %c0_158], %161 {strides = array<i32>} : memref<2x4x16x16xf32, #tpu.memory_space<vmem>>, vector<1x1x16x16xf32>,
    %cst_159 = arith.constant dense<0.000000e+00> : vector<16x32xf32>
    %162 = tpu.matmul %97, %148, %cst_159 {dimension_numbers = #tpu.dot_dimension_numbers<[1], [0], [0], [1], [0, 0, 1, 1], [], []>} : vector<16x32xf32>, vector<32x32xf32>, vector<16x32xf32> -> vector<16x32xf32>
    %cst_160 = arith.constant dense<0.000000e+00> : vector<16x32xf32>
    %163 = tpu.matmul %158, %162, %cst_160 {dimension_numbers = #tpu.dot_dimension_numbers<[1], [0], [0], [1], [0, 0, 1, 1], [], []>} : vector<16x16xf32>, vector<16x32xf32>, vector<16x32xf32> -> vector<16x32xf32>
    %164 = arith.addf %144, %163 : vector<16x32xf32>
    %cst_161 = arith.constant dense<0.000000e+00> : vector<16x32xf32>
    %165 = tpu.matmul %158, %149, %cst_161 {dimension_numbers = #tpu.dot_dimension_numbers<[0], [0], [1], [1], [0, 1, 1, 1], [], []>} : vector<16x16xf32>, vector<16x32xf32>, vector<16x32xf32> -> vector<16x32xf32>
    %166 = arith.addf %164, %165 : vector<16x32xf32>
    %c3_162 = arith.constant 3 : index
    %c0_163 = arith.constant 0 : index
    %c0_164 = arith.constant 0 : index
    %c0_165 = arith.constant 0 : index
    %167 = vector.load %arg2[%c3_162, %c0_163, %c0_164, %c0_165] : memref<4x2x32x32xf32, #tpu.memory_space<vmem>>, vector<1x1x32x32xf32>
    %168 = vector.shape_cast %167 : vector<1x1x32x32xf32> to vector<32x32xf32>
    %c3_166 = arith.constant 3 : index
    %c1_167 = arith.constant 1 : index
    %c0_168 = arith.constant 0 : index
    %c0_169 = arith.constant 0 : index
    %169 = vector.load %arg2[%c3_166, %c1_167, %c0_168, %c0_169] : memref<4x2x32x32xf32, #tpu.memory_space<vmem>>, vector<1x1x32x32xf32>
    %170 = vector.shape_cast %169 : vector<1x1x32x32xf32> to vector<32x32xf32>
    %cst_170 = arith.constant dense<0.000000e+00> : vector<16x32xf32>
    %171 = tpu.matmul %97, %168, %cst_170 {dimension_numbers = #tpu.dot_dimension_numbers<[1], [0], [0], [1], [0, 0, 1, 1], [], []>} : vector<16x32xf32>, vector<32x32xf32>, vector<16x32xf32> -> vector<16x32xf32>
    %cst_171 = arith.constant dense<0.000000e+00> : vector<16x16xf32>
    %172 = tpu.matmul %171, %99, %cst_171 {dimension_numbers = #tpu.dot_dimension_numbers<[1], [1], [0], [0], [0, 0, 1, 0], [], []>} : vector<16x32xf32>, vector<16x32xf32>, vector<16x16xf32> -> vector<16x16xf32>
    %c1_172 = arith.constant 1 : index
    %c0_173 = arith.constant 0 : index
    %c0_174 = arith.constant 0 : index
    %c0_175 = arith.constant 0 : index
    %173 = vector.load %arg3[%c1_172, %c0_173, %c0_174, %c0_175] : memref<2x1x16x16xf32, #tpu.memory_space<vmem>>, vector<1x1x16x16xf32>
    %174 = vector.shape_cast %173 : vector<1x1x16x16xf32> to vector<16x16xf32>
    %175 = arith.addf %172, %174 : vector<16x16xf32>
    %176 = arith.negf %175 : vector<16x16xf32>
    %177 = math.exp %176 : vector<16x16xf32>
    %cst_176 = arith.constant 1.000000e+00 : f32
    %178 = vector.broadcast %cst_176 : f32 to vector<16x16xf32>
    %179 = arith.addf %178, %177 : vector<16x16xf32>
    %180 = arith.divf %178, %179 : vector<16x16xf32>
    %c1_177 = arith.constant 1 : index
    %c3_178 = arith.constant 3 : index
    %c0_179 = arith.constant 0 : index
    %c0_180 = arith.constant 0 : index
    %181 = vector.load %arg5[%c1_177, %c3_178, %c0_179, %c0_180] : memref<2x4x16x16xf32, #tpu.memory_space<vmem>>, vector<1x1x16x16xf32>
    %182 = vector.shape_cast %181 : vector<1x1x16x16xf32> to vector<16x16xf32>
    %183 = vector.shape_cast %180 : vector<16x16xf32> to vector<1x1x16x16xf32>
    tpu.vector_store %arg5[%c1_177, %c3_178, %c0_179, %c0_180], %183 {strides = array<i32>} : memref<2x4x16x16xf32, #tpu.memory_space<vmem>>, vector<1x1x16x16xf32>,
    %cst_181 = arith.constant dense<0.000000e+00> : vector<16x32xf32>
    %184 = tpu.matmul %97, %170, %cst_181 {dimension_numbers = #tpu.dot_dimension_numbers<[1], [0], [0], [1], [0, 0, 1, 1], [], []>} : vector<16x32xf32>, vector<32x32xf32>, vector<16x32xf32> -> vector<16x32xf32>
    %cst_182 = arith.constant dense<0.000000e+00> : vector<16x32xf32>
    %185 = tpu.matmul %180, %184, %cst_182 {dimension_numbers = #tpu.dot_dimension_numbers<[1], [0], [0], [1], [0, 0, 1, 1], [], []>} : vector<16x16xf32>, vector<16x32xf32>, vector<16x32xf32> -> vector<16x32xf32>
    %186 = arith.addf %166, %185 : vector<16x32xf32>
    %cst_183 = arith.constant dense<0.000000e+00> : vector<16x32xf32>
    %187 = tpu.matmul %180, %171, %cst_183 {dimension_numbers = #tpu.dot_dimension_numbers<[0], [0], [1], [1], [0, 1, 1, 1], [], []>} : vector<16x16xf32>, vector<16x32xf32>, vector<16x32xf32> -> vector<16x32xf32>
    %188 = arith.addf %186, %187 : vector<16x32xf32>
    %c1_184 = arith.constant 1 : index
    %c0_185 = arith.constant 0 : index
    %c0_186 = arith.constant 0 : index
    %189 = vector.load %arg4[%c1_184, %c0_185, %c0_186] : memref<2x16x32xf32, #tpu.memory_space<vmem>>, vector<1x16x32xf32>
    %190 = vector.shape_cast %189 : vector<1x16x32xf32> to vector<16x32xf32>
    %191 = vector.shape_cast %188 : vector<16x32xf32> to vector<1x16x32xf32>
    tpu.vector_store %arg4[%c1_184, %c0_185, %c0_186], %191 {strides = array<i32>} : memref<2x16x32xf32, #tpu.memory_space<vmem>>, vector<1x16x32xf32>,
    return
  }
  func.func @transform_0(%arg0: i32) -> (i32, i32, i32) {
    %c0_i32 = arith.constant 0 : i32
    %c0_i32_0 = arith.constant 0 : i32
    %c0_i32_1 = arith.constant 0 : i32
    return %arg0, %c0_i32, %c0_i32_0 : i32, i32, i32
  }
  func.func @transform_1(%arg0: i32) -> (i32, i32, i32, i32) {
    %c0_i32 = arith.constant 0 : i32
    %c0_i32_0 = arith.constant 0 : i32
    %c0_i32_1 = arith.constant 0 : i32
    %c0_i32_2 = arith.constant 0 : i32
    %c0_i32_3 = arith.constant 0 : i32
    return %c0_i32, %c0_i32_0, %c0_i32_1, %c0_i32_2 : i32, i32, i32, i32
  }
  func.func @transform_2(%arg0: i32) -> (i32, i32, i32, i32) {
    %c0_i32 = arith.constant 0 : i32
    %c0_i32_0 = arith.constant 0 : i32
    %c0_i32_1 = arith.constant 0 : i32
    %c0_i32_2 = arith.constant 0 : i32
    return %arg0, %c0_i32, %c0_i32_0, %c0_i32_1 : i32, i32, i32, i32
  }
  func.func @transform_3(%arg0: i32) -> (i32, i32, i32) {
    %c0_i32 = arith.constant 0 : i32
    %c0_i32_0 = arith.constant 0 : i32
    %c0_i32_1 = arith.constant 0 : i32
    return %arg0, %c0_i32, %c0_i32_0 : i32, i32, i32
  }
  func.func @transform_4(%arg0: i32) -> (i32, i32, i32, i32) {
    %c0_i32 = arith.constant 0 : i32
    %c0_i32_0 = arith.constant 0 : i32
    %c0_i32_1 = arith.constant 0 : i32
    %c0_i32_2 = arith.constant 0 : i32
    return %arg0, %c0_i32, %c0_i32_0, %c0_i32_1 : i32, i32, i32, i32
  }
}

</mosaic_0001>

<bundles_post_ra>
// kernel: tpu_custom_call.1
= control target key start
LH: loop header
LB: loop body
LE: loop exit
PB: predicated region body
PF: predicated region fallthrough
CT: control target
= control target key end

     0   :  { %10 = vsyncpa [#allocation3], 0  ;;  %s6145_s0 = inlined_call_operand.hbm [shape: f32[4,16,32], index: 0, kind: input, shape index: {}]   ;;  %s6146_s1 = inlined_call_operand.hbm [shape: f32[4,2,32,32], index: 1, kind: input, shape index: {}]   ;;  %s6147_s2 = inlined_call_operand.hbm [shape: f32[4,1,16,16], index: 2, kind: input, shape index: {}]   ;;  %s6148_s3 = inlined_call_operand.hbm [shape: f32[4,16,32], index: 3, kind: output, shape index: {0}]   ;;  %s6149_s4 = inlined_call_operand.hbm [shape: f32[4,4,16,16], index: 4, kind: output, shape index: {1}]  }
   0x1   :  { %12 = vsyncpa [#allocation3 + $0x1], 0 }
   0x2   :  { %13 = vsyncpa [#allocation6], 0 }
   0x3   :  { %14 = vsyncpa [#allocation4], 0 }
   0x4   :  { %16 = vsyncpa [#allocation4 + $0x1], 0 }
   0x5   :  { %17 = vsyncpa [#allocation10], 0 }
   0x6   :  { %19 = vsyncpa [#allocation10 + $0x1], 0  ;;  %s5472_s15 = smov 0   ;;  %s5474_s16 = smov 0  }
   0x7   :  { %s5476_s17 = smov 0   ;;  %s5478_s18 = smov 0  }
   0x8 LB: > { %s5493_s19 = sadd.s32 1, %s5436_s18   ;;  %s32_s20 = sadd.s32 1, %s5432_s17  ;;  %s5436_s18 = sphi %s5478_s18, %s6174_s18   ;;  %s5432_s17 = sphi %s5476_s17, %s6173_s17   ;;  %s5428_s16 = sphi %s5474_s16, %s6172_s16   ;;  %s5424_s15 = sphi %s5472_s15, %s6171_s15  }
   0x9   : > { %s29_s21 = ssub.s32 %s5436_s18, %s5493_s19  ;;  %p39_p0 = scmp.ne.s32.totalorder %s5432_s17, %s5428_s16 }
   0xa   : > { %p30_p1 = scmp.eq.s32.totalorder %s29_s21, 0  ;;  %p40_p2 = scmp.eq.s32.totalorder %s5436_s18, 0 }
   0xb   : > { %p5137_p5 = scmp.lt.s32.totalorder %s5436_s18, 2  ;;  %s181_s23 = sand.u32 1, %s5436_s18  }
   0xc   : > { %s5502_s22 = scalar_select %p30_p1, %s5432_s17, %s32_s20  }
   0xd   : > { %p41_p3 = por %p40_p2, %p39_p0  ;;  %s183_s24 = sand.u32 1, %s5432_s17  }
   0xe   : > { %s5511_s25 = sshll.u32 %s183_s24, 5  ;;  %s4295_s26 = sshll.u32 %s5436_s18, 9 }
   0xf   : > { %s5519_s29 = scalar_lea.hbm %s6145_s0, %s4295_s26  ;;  %s185_s30 = scalar_lea.vmem [#allocation2], %s5511_s25 }
  0x10   : > { %s193_s5 = sshll.u32 %s185_s30, 4  ;;  %p5522_p6 = pnand %p5137_p5, %p41_p3  ;;  %s5526_s5 = int_to_ptr.vmem [resolvable:$true] %s193_s5 }
  0x11   : > { %s5528_s7 = scalar_lea.sflag [#allocation3], %s181_s23  ;;  %s5242_s8 = scalar_lea.hbm %s5519_s29, 512 }
  0x12   : > { %p5243_p7 = scmp.ne.s32.totalorder %s5519_s29, %s5242_s8  ;;  %p5244_p8 = pneg %p5522_p6 }
  0x13   : > { %s5247_s11 = scalar_lea.hbm %s6145_s0, 1024  ;;  %p5248_p11 = scmp.lt.u32.totalorder %s5519_s29, %s6145_s0 }
  0x14   : > { %p5245_p9 = pnand %p5244_p8, %p5243_p7  ;;  %p5249_p12 = scmp.lt.u32.totalorder %s5247_s11, %s5242_s8 }
  0x15   : > { %p5251_p1 = scmp.lt.u32.totalorder %s5242_s8, %s5519_s29 }
  0x16   : > { %p5246_p10 = pneg %p5245_p9  ;;  %p5250_p13 = por %p5249_p12, %p5248_p11 }
  0x18   : > { %p5252_p2 = por %p5251_p1, %p5250_p13 }
  0x1a   : > { %p5253_p3 = pnand %p5252_p2, %p5246_p10 }
  0x1c   : > { %5256 = shalt.err (!%p5253_p3)
}
  0x1d   : > { %s5257_s14 = scalar_lea.vmem %s5526_s5, 512  ;;  %s5438_s20 = smov [#allocation2]  }
  0x1e   : > { %p5258_p5 = scmp.ne.s32.totalorder %s5526_s5, %s5257_s14  ;;  %s5262_s21 = sshll.u32 %s5438_s20, 4  ;;  %s5263_s21 = int_to_ptr.vmem [resolvable:$false] %s5262_s21 }
  0x1f   : > { %s5264_s23 = scalar_lea.vmem %s5263_s21, 1024  ;;  %p5265_p4 = scmp.lt.s32.totalorder %s5526_s5, %s5263_s21 }
  0x20   : > { %p5260_p7 = pnand %p5258_p5, %p5244_p8  ;;  %p5266_p11 = scmp.lt.s32.totalorder %s5264_s23, %s5257_s14 }
  0x22   : > { %p5261_p9 = pneg %p5260_p7  ;;  %p5267_p12 = por %p5266_p11, %p5265_p4 }
  0x24   : > { %p5268_p13 = pnand %p5267_p12, %p5261_p9 }
  0x26   : > { %5271 = shalt.err (!%p5268_p13)
}
  0x27   : > { %s5439_s24 = smov 128   ;;  %s5440_s27 = smov 8  }
  0x28   : > { %5125 = dma.hbm_to_vmem [thread:$0]  (!%p5522_p6), %s5519_s29, 512, %s5526_s5, %s5528_s7, %s5439_s24, %s5439_s24, %s5440_s27  }
  0x29   : > { %s207_s28 = scalar_lea.vmem [#allocation7], %s5511_s25  ;;  %s5561_s8 = sadd.s32 4294967295, %s5436_s18  }
  0x2a   : > { %s215_s30 = sshll.u32 %s207_s28, 4  ;;  %s4128_s9 = sadd.s32 4294967294, %s5436_s18   ;;  %s5594_s30 = int_to_ptr.vmem [resolvable:$true] %s215_s30 }
  0x2b   : > { %p45_p4 = scmp.ne.s32.totalorder %s5428_s16, %s5424_s15  ;;  %p6150_p10 = scmp.eq.s32.totalorder %s5561_s8, 0 }
  0x2c   : > { %p116_p1 = scmp.eq.s32.totalorder %s5561_s8, 1  ;;  %p122_p2 = scmp.eq.s32.totalorder %s4128_s9, 1 }
  0x2d   : > { %p5570_p3 = por %p6150_p10, %p45_p4  ;;  %p4129_p5 = scmp.ge.s32.totalorder %s5436_s18, 1 }
  0x2e   : > { %p5578_p7 = por %p116_p1, %p39_p0  ;;  %p5582_p9 = por %p122_p2, %p45_p4 }
  0x2f   : > { %s6155_s10 = scalar_select %p5570_p3, 1, 0 }
  0x30   : > { %s6156_s25 = scalar_select %p5578_p7, 1, 0 }
  0x31   : > { %s6157_s29 = scalar_select %p5582_p9, 1, 0 }
  0x32   : > { %p155_p11 = scmp.lt.s32.totalorder %s5436_s18, 3  ;;  %s5592_s12 = scalar_lea.hbm %s6147_s2, %s4295_s26 }
  0x33   : > { %s5441_s14 = smov [#allocation5]   ;;  %s5272_s21 = scalar_lea.hbm %s5592_s12, 512 }
  0x34   : > { %p5596_p0 = pnand %p4129_p5, %p155_p11  ;;  %s5600_s20 = sshll.u32 %s5441_s14, 4  ;;  %s168_s20 = int_to_ptr.vmem [resolvable:$true] %s5600_s20 }
  0x35   : > { %p5273_p13 = scmp.ne.s32.totalorder %s5592_s12, %s5272_s21  ;;  %s5277_s28 = scalar_lea.hbm %s6147_s2, 1024 }
  0x36   : > { %s6158_s13 = scalar_select %p5596_p0, 1, 0 }
  0x37   : > { %p5275_p4 = pnand %p5273_p13, %p5244_p8  ;;  %p5278_p2 = scmp.lt.u32.totalorder %s5592_s12, %s6147_s2 }
  0x38   : > { %p5279_p5 = scmp.lt.u32.totalorder %s5277_s28, %s5272_s21  ;;  %p5281_p10 = scmp.lt.u32.totalorder %s5272_s21, %s5592_s12 }
  0x39   : > { %p5276_p1 = pneg %p5275_p4 }
  0x3a   : > { %p5280_p11 = por %p5279_p5, %p5278_p2 }
  0x3c   : > { %p5282_p9 = por %p5281_p10, %p5280_p11 }
  0x3e   : > { %p5283_p7 = pnand %p5282_p9, %p5276_p1 }
  0x40   : > { %5286 = shalt.err (!%p5283_p7)
}
  0x41   : > { %s5287_s11 = scalar_lea.vmem %s5594_s30, 512  ;;  %s5442_s14 = smov [#allocation7]  }
  0x42   : > { %p5288_p13 = scmp.ne.s32.totalorder %s5594_s30, %s5287_s11  ;;  %s5292_s26 = sshll.u32 %s5442_s14, 4  ;;  %s5293_s26 = int_to_ptr.vmem [resolvable:$false] %s5292_s26 }
  0x43   : > { %s5294_s23 = scalar_lea.vmem %s5293_s26, 1024  ;;  %p5295_p3 = scmp.lt.s32.totalorder %s5594_s30, %s5293_s26 }
  0x44   : > { %p5290_p4 = pnand %p5288_p13, %p5244_p8  ;;  %p5296_p2 = scmp.lt.s32.totalorder %s5294_s23, %s5287_s11 }
  0x46   : > { %p5291_p12 = pneg %p5290_p4  ;;  %p5297_p5 = por %p5296_p2, %p5295_p3 }
  0x48   : > { %p5298_p10 = pnand %p5297_p5, %p5291_p12 }
  0x4a   : > { %5301 = shalt.err (!%p5298_p10)
}
  0x4b   : > { %5128 = dma.hbm_to_vmem [thread:$0]  (!%p5522_p6), %s5592_s12, 512, %s5594_s30, %s5528_s7, %s5439_s24, %s5439_s24, %s5440_s27  }
  0x4c   : > { %p6159_p8 = scmp.eq.s32.totalorder %s5561_s8, 0  ;;  %p6160_p7 = pneg %p5596_p0 }
  0x4d   : > { %s5302_s9 = scalar_lea.hbm %s6146_s1, 4096 }
  0x4e   : > { %p5637_p9 = pnand %p6160_p7, %p6159_p8  ;;  %p5303_p3 = scmp.ne.s32.totalorder %s6146_s1, %s5302_s9 }
  0x4f   : > { %p5309_p11 = scmp.lt.u32.totalorder %s5302_s9, %s6146_s1 }
  0x50   : > { %p5304_p12 = pneg %p5637_p9 }
  0x52   : > { %p5305_p6 = pnand %p5304_p12, %p5303_p3 }
  0x54   : > { %p5306_p1 = pneg %p5305_p6 }
  0x56   : > { %p5311_p13 = pnand %p5309_p11, %p5306_p1 }
  0x58   : > { %5314 = shalt.err (!%p5311_p13)
}
  0x59   : > { %s5315_s12 = scalar_lea.vmem %s168_s20, 4096  ;;  %p5323_p10 = scmp.lt.s32.totalorder %s168_s20, %s168_s20 }
  0x5a   : > { %p5316_p4 = scmp.ne.s32.totalorder %s168_s20, %s5315_s12  ;;  %p5324_p8 = scmp.lt.s32.totalorder %s5315_s12, %s5315_s12 }
  0x5c   : > { %p5318_p2 = pnand %p5316_p4, %p5304_p12  ;;  %p5325_p7 = por %p5324_p8, %p5323_p10 }
  0x5e   : > { %p5319_p5 = pneg %p5318_p2 }
  0x60   : > { %p5326_p0 = pnand %p5325_p7, %p5319_p5 }
  0x62   : > { %5329 = shalt.err (!%p5326_p0)
}
  0x63   : > { %5121 = dma.hbm_to_vmem [thread:$0]  (!%p5637_p9), %s6146_s1, 4096, %s168_s20, [#allocation6], %s5439_s24, %s5439_s24, %s5440_s27  }
  0x64   : > { %p6162_p3 = scmp.ne.s32.totalorder %s6158_s13, 0 }
  0x65   : > { %s229_s23 = sand.u32 (!%p6162_p3), 1, %s5561_s8   ;;  %s5664_s28 = sand.u32 (!%p6162_p3), 1, %s5428_s16  }
  0x66   : > { %227 = sbr.rel (%p6162_p3) target bundleno = 3634 (0xe32), region = 32  ;;  %s5667_s6 = sshll.u32 (!%p6162_p3), %s5664_s28, 5 }
  0x67   : > { %s230_s21 = scalar_lea.sflag (!%p6162_p3), [#allocation3], %s229_s23  ;;  %s5670_s9 = scalar_lea.vmem (!%p6162_p3), [#allocation2], %s5667_s6 }
  0x68   : > { %p6163_p0 = scmp.ne.s32.totalorder (!%p6162_p3), %s6155_s10, 0 }
  0x6d   : > { %5403 = dma.done.wait (%p6163_p0), %s230_s21, 512  }
  0x6e   : > { %5405 = vsyncadd (%p6163_p0), %s230_s21, 4294966784  ;;  %p6164_p9 = scmp.eq.s32.totalorder %s5561_s8, 0 }
  0x70   : > { %5407 = dma.done.wait (%p6164_p9), [#allocation6], 4096   ;;  %p6165_p12 = pmov %p6164_p9 }
  0x71   : > { %s5681_s24 = scalar_lea.vmem [#allocation7], %s5667_s6 }
  0x72   : > { %5409 = vsyncadd (%p6165_p12), [#allocation6], 4294963200 }
  0x73   : > { %5411 = dma.done.wait (%p6163_p0), %s230_s21, 512  }
  0x74   : > { %5413 = vsyncadd (%p6163_p0), %s230_s21, 4294966784  ;;  %vm298_vm0 = vcmask 261120   ;;  %v289_v0 = vld [vmem:[#allocation5] sm:$0xff]  ;;  %v290_v1 = vld [vmem:[#allocation5 + $0x8] sm:$0xff]  ;;  %s4145_s27 = sshll.u32 %s5664_s28, 7  ;;  %vm481_vm2 = vcmask 130048  }
  0x75   : > { %v291_v2 = vld [vmem:[#allocation5 + $0x10] sm:$0xff]  ;;  %v5687_v3 = vpack.c.bf16 %v290_v1, %v289_v0  ;;  %v292_v4 = vld [vmem:[#allocation5 + $0x18] sm:$0xff]  ;;  %v5690_v5 = vld [vmem:[%s5670_s9] sm:$0xff]  ;;  %s5770_s10 = scalar_lea.vmem [#allocation9], %s4145_s27  ;;  %s5975_s13 = scalar_lea.vmem [#allocation8], %s5667_s6 }
  0x76   : > { %v5693_v6 = vld [vmem:[%s5670_s9 + $0x8] sm:$0xff]  ;;  %v5695_v7 = vpack.c.bf16 %v292_v4, %v291_v2  ;;  %4502 = vmatprep.mubr.msk.f32.mxu0 %vm298_vm0, %v5690_v5  ;;  %v287_v8 = vmul.f32 0.5, %v5690_v5  ;;  %vm5704_vm1 = vmpackc.low %vm298_vm0, %vm298_vm0  ;;  %v294_v12 = vld [vmem:[#allocation5 + $0x20] sm:$0xff]  ;;  %s4301_s20 = sshll.u32 %s5561_s8, 11  ;;  %s3993_s5 = sshll.u32 %s5770_s10, 4  ;;  %s6058_s5 = int_to_ptr.vmem [resolvable:$true] %s3993_s5 }
  0x77   : > { %v288_v9 = vmul.f32 0.5, %v5693_v6  ;;  %4839 = vmatprep.subr.bf16.mxu0 %v5687_v3  ;;  %v295_v13 = vld [vmem:[#allocation5 + $0x28] sm:$0xff]  ;;  %v296_v14 = vld [vmem:[#allocation5 + $0x30] sm:$0xff]  ;;  %v297_v16 = vld [vmem:[#allocation5 + $0x38] sm:$0xff]  ;;  %s6056_s30 = scalar_lea.hbm %s6149_s4, %s4301_s20  ;;  %s3962_s12 = scalar_lea.sflag [#allocation10], %s5664_s28 }
  0x78   : > { %4841 = vmatpush3.bf16.msra.mxu0 %v5687_v3  ;;  %v5723_v15 = vpack.c.bf16 %v295_v13, %v294_v12  ;;  %v5725_v17 = vpack.c.bf16 %v297_v16, %v296_v14  ;;  %v754_v18 = vld [vmem:[#allocation5 + $0x40] sm:$0xff]  ;;  %v755_v19 = vld [vmem:[#allocation5 + $0x48] sm:$0xff]  ;;  %v756_v21 = vld [vmem:[#allocation5 + $0x50] sm:$0xff]  ;;  %s5330_s14 = scalar_lea.vmem %s6058_s5, 2048  ;;  %p6168_p1 = scmp.ne.s32.totalorder %s6156_s25, 0 }
  0x79   : > { %v5709_v11 = vpack.c.bf16 %v288_v9, %v287_v8  ;;  %4843 = vmatprep.subr.bf16.mxu0 %v5695_v7  ;;  %v5730_v20 = vpack.c.bf16 %v755_v19, %v754_v18  ;;  %v757_v22 = vld [vmem:[#allocation5 + $0x58] sm:$0xff]  ;;  %v759_v24 = vld [vmem:[#allocation5 + $0x60] sm:$0xff]  ;;  %v760_v25 = vld [vmem:[#allocation5 + $0x68] sm:$0xff]  ;;  %p5331_p6 = scmp.ne.s32.totalorder %s6058_s5, %s5330_s14  ;;  %s5443_s26 = smov [#allocation9]  }
  0x7a   : > { %v5734_v23 = vpack.c.bf16 %v757_v22, %v756_v21  ;;  %v5742_v26 = vpack.c.bf16 %v760_v25, %v759_v24  ;;  %v761_v27 = vld [vmem:[#allocation5 + $0x70] sm:$0xff]  ;;  %v762_v28 = vld [vmem:[#allocation5 + $0x78] sm:$0xff]  ;;  %v5762_v36 = vld [vmem:[%s5681_s24 + $0x8] sm:$0xff]  ;;  %s5334_s23 = sshll.u32 %s5443_s26, 4  ;;  %s5335_s23 = int_to_ptr.vmem [resolvable:$false] %s5334_s23 }
  0x7b   : > { %4848 = vmatprep.subr.msk.bf16.mxu1 %vm5704_vm1, %v5709_v11  ;;  %v5746_v29 = vpack.c.bf16 %v762_v28, %v761_v27  ;;  %v5765_v37 = vld [vmem:[%s5681_s24] sm:$0xff]  ;;  %v1211_v57 = vld [vmem:[#allocation5 + $0x88] sm:$0xff]  ;;  %v1212_v58 = vld [vmem:[#allocation5 + $0x90] sm:$0xff]  ;;  %p5332_p11 = pnand %p5331_p6, %p6168_p1  ;;  %s5336_s6 = scalar_lea.vmem %s5335_s23, 4096 }
  0x7c   : > { %4851 = vmatpush3.bf16.xpose.msk.msra.mxu1 %vm5704_vm1, %v5709_v11  ;;  %4845 = vmatpush3.bf16.msra.mxu0 %v5695_v7  ;;  %v1210_v56 = vld [vmem:[#allocation5 + $0x80] sm:$0xff]  ;;  %v1213_v60 = vld [vmem:[#allocation5 + $0x98] sm:$0xff]  ;;  %v1216_v63 = vld [vmem:[#allocation5 + $0xa8] sm:$0xff]  ;;  %p5337_p4 = scmp.lt.s32.totalorder %s6058_s5, %s5335_s23  ;;  %p5338_p2 = scmp.lt.s32.totalorder %s5336_s6, %s5330_s14 }
  0x7d   : > { %4853 = vmatprep.subr.bf16.mxu0 %v5723_v15  ;;  %v5778_v59 = vpack.c.bf16 %v1211_v57, %v1210_v56  ;;  %v5780_v61 = vpack.c.bf16 %v1213_v60, %v1212_v58  ;;  %v1215_v62 = vld [vmem:[#allocation5 + $0xa0] sm:$0xff]  ;;  %v1217_v1 = vld [vmem:[#allocation5 + $0xb0] sm:$0xff]  ;;  %v1218_v2 = vld [vmem:[#allocation5 + $0xb8] sm:$0xff]  ;;  %p5333_p13 = pneg %p5332_p11 }
  0x7e   : > { %v5785_v0 = vpack.c.bf16 %v1216_v63, %v1215_v62  ;;  %v5789_v4 = vpack.c.bf16 %v1218_v2, %v1217_v1  ;;  %p5339_p5 = por %p5338_p2, %p5337_p4 }
  0x7f   : > { %4503 = vmatmul.mubr.msk.f32.vlgmr.msra.gmra.mrb[0].mxu0 %vm298_vm0, %v5693_v6 }
  0x80   : > { %4520 = vmatprep.mubr.msk.f32.mxu0 %vm298_vm0, %v5690_v5  ;;  %4855 = vmatpush3.bf16.msra.mxu0 %v5723_v15  ;;  %p5340_p10 = pnand %p5339_p5, %p5333_p13 }
  0x81   : > { %4857 = vmatprep.subr.bf16.mxu0 %v5725_v17 }
  0x84   : > { %4859 = vmatpush3.bf16.msra.mxu0 %v5725_v17 }
  0x85   : > { %4869 = vmatprep.subr.bf16.mxu0 %v5730_v20 }
  0x87   : > { %4521 = vmatmul.mubr.msk.f32.vlgmr.msra.gmra.mrb[2].mxu0 %vm298_vm0, %v5693_v6 }
  0x88   : > { %4871 = vmatpush3.bf16.msra.mxu0 %v5730_v20  ;;  %4545 = vmatprep.mubr.msk.f32.mxu0 %vm298_vm0, %v5690_v5 }
  0x89   : > { %4873 = vmatprep.subr.bf16.mxu0 %v5734_v23 }
  0x8c   : > { %4875 = vmatpush3.bf16.msra.mxu0 %v5734_v23 }
  0x8d   : > { %4883 = vmatprep.subr.bf16.mxu0 %v5742_v26 }
  0x8f   : > { %4546 = vmatmul.mubr.msk.f32.vlgmr.msra.gmra.mrb[4].mxu0 %vm298_vm0, %v5693_v6 }
  0x90   : > { %4885 = vmatpush3.bf16.msra.mxu0 %v5742_v26  ;;  %4563 = vmatprep.mubr.msk.f32.mxu0 %vm298_vm0, %v5690_v5 }
  0x91   : > { %4887 = vmatprep.subr.bf16.mxu0 %v5746_v29 }
  0x94   : > { %4889 = vmatpush3.bf16.msra.mxu0 %v5746_v29 }
  0x95   : > { %4899 = vmatprep.subr.bf16.mxu0 %v5778_v59 }
  0x97   : > { %4564 = vmatmul.mubr.msk.f32.vlgmr.msra.gmra.mrb[6].mxu0 %vm298_vm0, %v5693_v6 }
  0x98   : > { %4588 = vmatprep.mubr.msk.f32.mxu0 %vm298_vm0, %v5690_v5  ;;  %4901 = vmatpush3.bf16.msra.mxu0 %v5778_v59 }
  0x99   : > { %4903 = vmatprep.subr.bf16.mxu0 %v5780_v61 }
  0x9c   : > { %4905 = vmatpush3.bf16.msra.mxu0 %v5780_v61 }
  0x9d   : > { %4913 = vmatprep.subr.bf16.mxu0 %v5785_v0 }
  0x9f   : > { %4589 = vmatmul.mubr.msk.f32.vlgmr.msra.gmra.mrb[8].mxu0 %vm298_vm0, %v5693_v6 }
  0xa0   : > { %4915 = vmatpush3.bf16.msra.mxu0 %v5785_v0  ;;  %4606 = vmatprep.mubr.msk.f32.mxu0 %vm298_vm0, %v5690_v5 }
  0xa1   : > { %4917 = vmatprep.subr.bf16.mxu0 %v5789_v4 }
  0xa4   : > { %4919 = vmatpush3.bf16.msra.mxu0 %v5789_v4 }
  0xa7   : > { %4607 = vmatmul.mubr.msk.f32.vlgmr.msra.gmra.mrb[10].mxu0 %vm298_vm0, %v5693_v6 }
  0xa8   : > { %4631 = vmatprep.mubr.msk.f32.mxu0 %vm298_vm0, %v5690_v5 }
 0x152   : > { %v4504_v30 = vpop.f32.mrb[0].mxu0 }
 0x153   : > { %v371_v31 = vpop.f32.mrb[1].mxu0 }
 0x154   : > { %v4860_v32 = vpack.c.bf16 %v4504_v30, %v371_v31  ;;  %4509 = vmatprep.mubr.msk.f32.mxu1 %vm298_vm0, %v371_v31 }
 0x155   : > { %4510 = vmatmul.mubr.msk.f32.vlgmr.msra.gmra.mrb[0].mxu1 %vm298_vm0, %v4504_v30 }
 0x156   : > { %4861 = vmatprep.subr.bf16.mxu1 %v4860_v32 }
 0x157   : > { %4863 = vmatpush3.bf16.msra.mxu1 %v4860_v32 }
 0x15a   : > { %v4522_v33 = vpop.f32.mrb[2].mxu0 }
 0x15b   : > { %v550_v34 = vpop.f32.mrb[3].mxu0 }
 0x15c   : > { %v4864_v35 = vpack.c.bf16 %v4522_v33, %v550_v34 }
 0x15e   : > { %4865 = vmatprep.subr.bf16.mxu1 %v4864_v35 }
 0x162   : > { %v4547_v50 = vpop.f32.mrb[4].mxu0 }
 0x163   : > { %v829_v51 = vpop.f32.mrb[5].mxu0 }
 0x164   : > { %v5776_v52 = vpack.c.bf16 %v4547_v50, %v829_v51 }
 0x16a   : > { %v4565_v53 = vpop.f32.mrb[6].mxu0 }
 0x16b   : > { %v1002_v54 = vpop.f32.mrb[7].mxu0 }
 0x16c   : > { %v4890_v55 = vpack.c.bf16 %v4565_v53, %v1002_v54 }
 0x172   : > { %v4590_v30 = vpop.f32.mrb[8].mxu0 }
 0x173   : > { %v1285_v31 = vpop.f32.mrb[9].mxu0 }
 0x174   : > { %v5827_v32 = vpack.c.bf16 %v4590_v30, %v1285_v31 }
 0x17a   : > { %v4608_v33 = vpop.f32.mrb[10].mxu0 }
 0x17b   : > { %v1458_v34 = vpop.f32.mrb[11].mxu0 }
 0x228   : > { %v4511_v38 = vpop.f32.mrb[0].mxu1 }
 0x229   : > { %v466_v39 = vadd.f32 %v4511_v38, %v5762_v36  ;;  %v460_v40 = vpop.f32.mrb[1].mxu1  ;;  %v1666_v38 = vld [vmem:[#allocation5 + $0xc0] sm:$0xff] }
 0x22a   : > { %v461_v41 = vadd.f32 %v460_v40, %v5765_v37  ;;  %v1668_v40 = vld [vmem:[#allocation5 + $0xd0] sm:$0xff] }
 0x22b   : > { %v4153_v42 = vmul.f32 -1.442695, %v466_v39  ;;  %v1667_v39 = vld [vmem:[#allocation5 + $0xc8] sm:$0xff] }
 0x22c   : > { %v4152_v43 = vmul.f32 -1.442695, %v461_v41  ;;  %v5829_v41 = vpack.c.bf16 %v1667_v39, %v1666_v38 }
 0x22d   : > { %5178 = vpow2.f32 %v4153_v42  ;;  %v1669_v42 = vld [vmem:[#allocation5 + $0xd8] sm:$0xff] }
 0x22e   : > { %5180 = vpow2.f32 %v4152_v43  ;;  %v5831_v43 = vpack.c.bf16 %v1669_v42, %v1668_v40  ;;  %4929 = vmatprep.subr.bf16.mxu0 %v5829_v41 }
 0x22f   : > { %4931 = vmatpush3.bf16.msra.mxu0 %v5829_v41 }
 0x230   : > { %4933 = vmatprep.subr.bf16.mxu0 %v5831_v43 }
 0x233   : > { %4935 = vmatpush3.bf16.msra.mxu0 %v5831_v43 }
 0x236   : > { %4632 = vmatmul.mubr.msk.f32.vlgmr.msra.gmra.mrb[12].mxu0 %vm298_vm0, %v5693_v6 }
 0x237   : > { %v5179_v44 = vpop.eup %5178  ;;  %4649 = vmatprep.mubr.msk.f32.mxu0 %vm298_vm0, %v5690_v5 }
 0x238   : > { %v5181_v45 = vpop.eup %5180  ;;  %v476_v46 = vadd.f32 1.0, %v5179_v44  ;;  %v1671_v44 = vld [vmem:[#allocation5 + $0xe0] sm:$0xff] }
 0x239   : > { %v475_v47 = vadd.f32 1.0, %v5181_v45  ;;  %v1672_v45 = vld [vmem:[#allocation5 + $0xe8] sm:$0xff] }
 0x23a   : > { %5182 = vrcp.f32 %v476_v46  ;;  %v5836_v46 = vpack.c.bf16 %v1672_v45, %v1671_v44 }
 0x23b   : > { %5184 = vrcp.f32 %v475_v47  ;;  %v1673_v47 = vld [vmem:[#allocation5 + $0xf0] sm:$0xff] }
 0x23c   : > { %4943 = vmatprep.subr.bf16.mxu0 %v5836_v46 }
 0x23d   : > { %4945 = vmatpush3.bf16.msra.mxu0 %v5836_v46 }
 0x244   : > { %v5183_v48 = vpop.eup %5182 }
 0x245   : > { %v5185_v49 = vpop.eup %5184  ;;  %483 = vst.msk [vmem:[%s5770_s10 + $0x8] sm:$0xff] %vm481_vm2, %v5183_v48 }
 0x246   : > { %482 = vst.msk [vmem:[%s5770_s10] sm:$0xff] %vm481_vm2, %v5185_v49  ;;  %559 = vxpose.xlu0.b32.start [1/2] (short) (narrow) %v5185_v49, 16 }
 0x24a   : > { %560 = vxpose.xlu0.b32.end [2/2] (short) (narrow) %v5183_v48, 16 }
 0x2c6   : > { %v575_v8 = vpop.trf.xlu0 }
 0x2c7   : > { %4527 = vmatprep.mubr.msk.f32.mxu1 %vm481_vm2, %v575_v8 }
 0x2ca   : > { %v576_v9 = vpop.trf.xlu0 }
 0x2cb   : > { %4528 = vmatmul.mubr.msk.f32.vlgmr.msra.gmra.mrb[2].mxu1 %vm481_vm2, %v576_v9 }
 0x2cc   : > { %4867 = vmatpush3.bf16.msra.mxu1 %v4864_v35  ;;  %4534 = vmatprep.mubr.msk.f32.mxu1 %vm481_vm2, %v5185_v49  ;;  %v4920_v35 = vpack.c.bf16 %v4608_v33, %v1458_v34  ;;  %v5982_v34 = vld [vmem:[%s5681_s24 + $0x18] sm:$0xff] }
 0x2cd   : > { %4878 = vmatprep.subr.msk.bf16.mxu1 %vm5704_vm1, %v5709_v11 }
 0x2d3   : > { %4535 = vmatmul.mubr.msk.f32.vlgmr.msra.gmra.mrb[2].mxu1 %vm481_vm2, %v5183_v48  ;;  %v1674_v48 = vld [vmem:[#allocation5 + $0xf8] sm:$0xff] }
 0x2d4   : > { %4552 = vmatprep.mubr.msk.f32.mxu1 %vm298_vm0, %v829_v51  ;;  %v5840_v49 = vpack.c.bf16 %v1674_v48, %v1673_v47 }
 0x2d5   : > { %4881 = vmatpush3.bf16.xpose.msk.msra.mxu1 %vm5704_vm1, %v5709_v11 }
 0x2d6   : > { %4891 = vmatprep.subr.bf16.mxu1 %v4890_v55  ;;  %4947 = vmatprep.subr.bf16.mxu0 %v5840_v49 }
 0x2d7   : > { %4949 = vmatpush3.bf16.msra.mxu0 %v5840_v49 }
 0x2d8   : > { %4959 = vmatprep.subr.bf16.mxu0 %v5687_v3 }
 0x2da   : > { %4650 = vmatmul.mubr.msk.f32.vlgmr.msra.gmra.mrb[14].mxu0 %vm298_vm0, %v5693_v6 }
 0x2db   : > { %4961 = vmatpush3.bf16.msra.mxu0 %v5687_v3 }
 0x2dc   : > { %4553 = vmatmul.mubr.msk.f32.vlgmr.msra.gmra.mrb[4].mxu1 %vm298_vm0, %v4547_v50  ;;  %4963 = vmatprep.subr.bf16.mxu0 %v5695_v7 }
 0x2dd   : > { %4893 = vmatpush3.bf16.msra.mxu1 %v4890_v55 }
 0x2de   : > { %4895 = vmatprep.subr.bf16.mxu1 %v5776_v52 }
 0x2df   : > { %4965 = vmatpush3.bf16.msra.mxu0 %v5695_v7 }
 0x2e0   : > { %4973 = vmatprep.subr.bf16.mxu0 %v5723_v15 }
 0x309   : > { %v4633_v62 = vpop.f32.mrb[12].mxu0 }
 0x30a   : > { %v1741_v63 = vpop.f32.mrb[13].mxu0 }
 0x30b   : > { %v5876_v1 = vpack.c.bf16 %v4633_v62, %v1741_v63 }
 0x3ad   : > { %v4651_v2 = vpop.f32.mrb[14].mxu0 }
 0x3ae   : > { %v1914_v8 = vpop.f32.mrb[15].mxu0 }
 0x3af   : > { %v4554_v12 = vpop.f32.mrb[4].mxu1  ;;  %v4950_v9 = vpack.c.bf16 %v4651_v2, %v1914_v8 }
 0x3b0   : > { %v918_v13 = vadd.f32 %v4554_v12, %v5762_v36  ;;  %v912_v14 = vpop.f32.mrb[5].mxu1  ;;  %v5879_v12 = vld [vmem:[%s5670_s9 + $0x10] sm:$0xff] }
 0x3b1   : > { %v913_v16 = vadd.f32 %v912_v14, %v5765_v37  ;;  %4674 = vmatprep.mubr.msk.f32.mxu0 %vm298_vm0, %v5879_v12 }
 0x3b2   : > { %v4167_v18 = vmul.f32 -1.442695, %v918_v13  ;;  %v5882_v13 = vld [vmem:[%s5670_s9 + $0x18] sm:$0xff] }
 0x3b3   : > { %v4166_v19 = vmul.f32 -1.442695, %v913_v16  ;;  %4675 = vmatmul.mubr.msk.f32.vlgmr.msra.gmra.mrb[16].mxu0 %vm298_vm0, %v5882_v13 }
 0x3b4   : > { %5186 = vpow2.f32 %v4167_v18  ;;  %4975 = vmatpush3.bf16.msra.mxu0 %v5723_v15  ;;  %4692 = vmatprep.mubr.msk.f32.mxu0 %vm298_vm0, %v5879_v12 }
 0x3b5   : > { %5188 = vpow2.f32 %v4166_v19  ;;  %4977 = vmatprep.subr.bf16.mxu0 %v5725_v17 }
 0x3b8   : > { %4979 = vmatpush3.bf16.msra.mxu0 %v5725_v17 }
 0x3b9   : > { %4989 = vmatprep.subr.bf16.mxu0 %v5730_v20 }
 0x3bb   : > { %4693 = vmatmul.mubr.msk.f32.vlgmr.msra.gmra.mrb[18].mxu0 %vm298_vm0, %v5882_v13 }
 0x3bc   : > { %4991 = vmatpush3.bf16.msra.mxu0 %v5730_v20  ;;  %4717 = vmatprep.mubr.msk.f32.mxu0 %vm298_vm0, %v5879_v12 }
 0x3bd   : > { %4993 = vmatprep.subr.bf16.mxu0 %v5734_v23 }
 0x3be   : > { %v5187_v21 = vpop.eup %5186 }
 0x3bf   : > { %v5189_v22 = vpop.eup %5188  ;;  %v928_v24 = vadd.f32 1.0, %v5187_v21 }
 0x3c0   : > { %v927_v25 = vadd.f32 1.0, %v5189_v22  ;;  %4995 = vmatpush3.bf16.msra.mxu0 %v5734_v23 }
 0x3c1   : > { %5190 = vrcp.f32 %v928_v24  ;;  %5003 = vmatprep.subr.bf16.mxu0 %v5742_v26 }
 0x3c2   : > { %5192 = vrcp.f32 %v927_v25 }
 0x3c3   : > { %4718 = vmatmul.mubr.msk.f32.vlgmr.msra.gmra.mrb[20].mxu0 %vm298_vm0, %v5882_v13 }
 0x3c4   : > { %5005 = vmatpush3.bf16.msra.mxu0 %v5742_v26  ;;  %4735 = vmatprep.mubr.msk.f32.mxu0 %vm298_vm0, %v5879_v12 }
 0x3c5   : > { %5007 = vmatprep.subr.bf16.mxu0 %v5746_v29 }
 0x3c8   : > { %5009 = vmatpush3.bf16.msra.mxu0 %v5746_v29 }
 0x3c9   : > { %5019 = vmatprep.subr.bf16.mxu0 %v5778_v59 }
 0x3cb   : > { %v5191_v27 = vpop.eup %5190  ;;  %4736 = vmatmul.mubr.msk.f32.vlgmr.msra.gmra.mrb[22].mxu0 %vm298_vm0, %v5882_v13 }
 0x3cc   : > { %v5193_v28 = vpop.eup %5192  ;;  %4169 = vst.msk [vmem:[%s5770_s10 + $0x18] sm:$0xff] %vm481_vm2, %v5191_v27  ;;  %5021 = vmatpush3.bf16.msra.mxu0 %v5778_v59  ;;  %4760 = vmatprep.mubr.msk.f32.mxu0 %vm298_vm0, %v5879_v12 }
 0x3cd   : > { %4168 = vst.msk [vmem:[%s5770_s10 + $0x10] sm:$0xff] %vm481_vm2, %v5193_v28  ;;  %1094 = vxpose.xlu1.b32.start [1/2] (short) (narrow) %v5193_v28, 16  ;;  %4570 = vmatprep.mubr.msk.f32.mxu1 %vm481_vm2, %v5193_v28 }
 0x3ce   : > { %4571 = vmatmul.mubr.msk.f32.vlgmr.msra.gmra.mrb[2].mxu1 %vm481_vm2, %v5191_v27  ;;  %5023 = vmatprep.subr.bf16.mxu0 %v5780_v61 }
 0x3cf   : > { %4897 = vmatpush3.bf16.msra.mxu1 %v5776_v52 }
 0x3d0   : > { %4908 = vmatprep.subr.msk.bf16.mxu1 %vm5704_vm1, %v5709_v11  ;;  %5025 = vmatpush3.bf16.msra.mxu0 %v5780_v61 }
 0x3d1   : > { %1095 = vxpose.xlu1.b32.end [2/2] (short) (narrow) %v5191_v27, 16  ;;  %5033 = vmatprep.subr.bf16.mxu0 %v5785_v0 }
 0x3d3   : > { %4761 = vmatmul.mubr.msk.f32.vlgmr.msra.gmra.mrb[24].mxu0 %vm298_vm0, %v5882_v13 }
 0x3d4   : > { %5035 = vmatpush3.bf16.msra.mxu0 %v5785_v0  ;;  %4778 = vmatprep.mubr.msk.f32.mxu0 %vm298_vm0, %v5879_v12 }
 0x3d5   : > { %5037 = vmatprep.subr.bf16.mxu0 %v5789_v4 }
 0x3d8   : > { %5039 = vmatpush3.bf16.msra.mxu0 %v5789_v4 }
 0x3d9   : > { %5049 = vmatprep.subr.bf16.mxu0 %v5829_v41 }
 0x3db   : > { %4779 = vmatmul.mubr.msk.f32.vlgmr.msra.gmra.mrb[26].mxu0 %vm298_vm0, %v5882_v13 }
 0x3dc   : > { %5051 = vmatpush3.bf16.msra.mxu0 %v5829_v41  ;;  %4803 = vmatprep.mubr.msk.f32.mxu0 %vm298_vm0, %v5879_v12 }
 0x3dd   : > { %5053 = vmatprep.subr.bf16.mxu0 %v5831_v43 }
 0x3e0   : > { %5055 = vmatpush3.bf16.msra.mxu0 %v5831_v43 }
 0x3e1   : > { %5063 = vmatprep.subr.bf16.mxu0 %v5836_v46 }
 0x3e3   : > { %4804 = vmatmul.mubr.msk.f32.vlgmr.msra.gmra.mrb[28].mxu0 %vm298_vm0, %v5882_v13 }
 0x3e4   : > { %5065 = vmatpush3.bf16.msra.mxu0 %v5836_v46  ;;  %4821 = vmatprep.mubr.msk.f32.mxu0 %vm298_vm0, %v5879_v12 }
 0x3e5   : > { %5067 = vmatprep.subr.bf16.mxu0 %v5840_v49 }
 0x3e8   : > { %5069 = vmatpush3.bf16.msra.mxu0 %v5840_v49 }
 0x3eb   : > { %4822 = vmatmul.mubr.msk.f32.vlgmr.msra.gmra.mrb[30].mxu0 %vm298_vm0, %v5882_v13 }
 0x44d   : > { %v1110_v50 = vpop.trf.xlu1 }
 0x44e   : > { %4577 = vmatprep.mubr.msk.f32.mxu1 %vm481_vm2, %v1110_v50 }
 0x451   : > { %v1111_v5 = vpop.trf.xlu1 }
 0x452   : > { %4578 = vmatmul.mubr.msk.f32.vlgmr.msra.gmra.mrb[2].mxu1 %vm481_vm2, %v1111_v5 }
 0x453   : > { %4911 = vmatpush3.bf16.xpose.msk.msra.mxu1 %vm5704_vm1, %v5709_v11  ;;  %4595 = vmatprep.mubr.msk.f32.mxu1 %vm298_vm0, %v1285_v31 }
 0x454   : > { %4921 = vmatprep.subr.bf16.mxu1 %v4920_v35 }
 0x45a   : > { %4596 = vmatmul.mubr.msk.f32.vlgmr.msra.gmra.mrb[6].mxu1 %vm298_vm0, %v4590_v30 }
 0x45b   : > { %4923 = vmatpush3.bf16.msra.mxu1 %v4920_v35  ;;  %v5985_v35 = vld [vmem:[%s5681_s24 + $0x10] sm:$0xff] }
 0x45c   : > { %4925 = vmatprep.subr.bf16.mxu1 %v5827_v32 }
 0x486   : > { %v4676_v21 = vpop.f32.mrb[16].mxu0 }
 0x487   : > { %v2208_v22 = vpop.f32.mrb[17].mxu0 }
 0x488   : > { %v4980_v24 = vpack.c.bf16 %v4676_v21, %v2208_v22 }
 0x48e   : > { %v4694_v28 = vpop.f32.mrb[18].mxu0 }
 0x48f   : > { %v2388_v30 = vpop.f32.mrb[19].mxu0 }
 0x490   : > { %v4984_v31 = vpack.c.bf16 %v4694_v28, %v2388_v30 }
 0x496   : > { %v4719_v50 = vpop.f32.mrb[20].mxu0 }
 0x497   : > { %v2665_v5 = vpop.f32.mrb[21].mxu0 }
 0x52d   : > { %v4597_v3 = vpop.f32.mrb[6].mxu1 }
 0x52e   : > { %v1374_v6 = vadd.f32 %v4597_v3, %v5762_v36  ;;  %v1368_v7 = vpop.f32.mrb[7].mxu1  ;;  %v5014_v3 = vpack.c.bf16 %v4719_v50, %v2665_v5 }
 0x52f   : > { %v1369_v51 = vadd.f32 %v1368_v7, %v5765_v37 }
 0x530   : > { %v4183_v52 = vmul.f32 -1.442695, %v1374_v6  ;;  %v4737_v6 = vpop.f32.mrb[22].mxu0 }
 0x531   : > { %v4182_v53 = vmul.f32 -1.442695, %v1369_v51  ;;  %v2838_v7 = vpop.f32.mrb[23].mxu0 }
 0x532   : > { %5194 = vpow2.f32 %v4183_v52  ;;  %v5010_v51 = vpack.c.bf16 %v4737_v6, %v2838_v7 }
 0x533   : > { %5196 = vpow2.f32 %v4182_v53 }
 0x53c   : > { %v5195_v54 = vpop.eup %5194 }
 0x53d   : > { %v5197_v55 = vpop.eup %5196  ;;  %v1384_v56 = vadd.f32 1.0, %v5195_v54 }
 0x53e   : > { %v1383_v57 = vadd.f32 1.0, %v5197_v55 }
 0x53f   : > { %5198 = vrcp.f32 %v1384_v56 }
 0x540   : > { %5200 = vrcp.f32 %v1383_v57 }
 0x549   : > { %v5199_v58 = vpop.eup %5198 }
 0x54a   : > { %v5201_v60 = vpop.eup %5200  ;;  %4185 = vst.msk [vmem:[%s5770_s10 + $0x28] sm:$0xff] %vm481_vm2, %v5199_v58 }
 0x54b   : > { %4184 = vst.msk [vmem:[%s5770_s10 + $0x20] sm:$0xff] %vm481_vm2, %v5201_v60  ;;  %1550 = vxpose.xlu0.b32.start [1/2] (short) (narrow) %v5201_v60, 16  ;;  %4613 = vmatprep.mubr.msk.f32.mxu1 %vm481_vm2, %v5201_v60 }
 0x54c   : > { %4614 = vmatmul.mubr.msk.f32.vlgmr.msra.gmra.mrb[2].mxu1 %vm481_vm2, %v5199_v58 }
 0x54d   : > { %4927 = vmatpush3.bf16.msra.mxu1 %v5827_v32 }
 0x54e   : > { %4938 = vmatprep.subr.msk.bf16.mxu1 %vm5704_vm1, %v5709_v11 }
 0x54f   : > { %1551 = vxpose.xlu0.b32.end [2/2] (short) (narrow) %v5199_v58, 16 }
 0x5cb   : > { %v1566_v15 = vpop.trf.xlu0 }
 0x5cc   : > { %4620 = vmatprep.mubr.msk.f32.mxu1 %vm481_vm2, %v1566_v15 }
 0x5cf   : > { %v1567_v17 = vpop.trf.xlu0 }
 0x5d0   : > { %4621 = vmatmul.mubr.msk.f32.vlgmr.msra.gmra.mrb[2].mxu1 %vm481_vm2, %v1567_v17 }
 0x5d1   : > { %4941 = vmatpush3.bf16.xpose.msk.msra.mxu1 %vm5704_vm1, %v5709_v11  ;;  %4638 = vmatprep.mubr.msk.f32.mxu1 %vm298_vm0, %v1741_v63 }
 0x5d2   : > { %4951 = vmatprep.subr.bf16.mxu1 %v4950_v9 }
 0x5d8   : > { %4639 = vmatmul.mubr.msk.f32.vlgmr.msra.gmra.mrb[8].mxu1 %vm298_vm0, %v4633_v62 }
 0x5d9   : > { %4953 = vmatpush3.bf16.msra.mxu1 %v4950_v9 }
 0x5da   : > { %4955 = vmatprep.subr.bf16.mxu1 %v5876_v1 }
 0x6ab   : > { %v4640_v20 = vpop.f32.mrb[8].mxu1 }
 0x6ac   : > { %v1830_v23 = vadd.f32 %v4640_v20, %v5762_v36  ;;  %v1824_v26 = vpop.f32.mrb[9].mxu1  ;;  %v2126_v36 = vmul.f32 0.5, %v5879_v12  ;;  %v4762_v12 = vpop.f32.mrb[24].mxu0 }
 0x6ad   : > { %v1825_v29 = vadd.f32 %v1824_v26, %v5765_v37  ;;  %v2127_v37 = vmul.f32 0.5, %v5882_v13  ;;  %v3119_v13 = vpop.f32.mrb[25].mxu0 }
 0x6ae   : > { %v4199_v59 = vmul.f32 -1.442695, %v1830_v23  ;;  %v5044_v15 = vpack.c.bf16 %v4762_v12, %v3119_v13  ;;  %v4780_v17 = vpop.f32.mrb[26].mxu0 }
 0x6af   : > { %v4198_v61 = vmul.f32 -1.442695, %v1825_v29  ;;  %v5962_v19 = vpack.c.bf16 %v2127_v37, %v2126_v36  ;;  %v3292_v20 = vpop.f32.mrb[27].mxu0 }
 0x6b0   : > { %5202 = vpow2.f32 %v4199_v59  ;;  %v5040_v23 = vpack.c.bf16 %v4780_v17, %v3292_v20 }
 0x6b1   : > { %5204 = vpow2.f32 %v4198_v61 }
 0x6ba   : > { %v5203_v11 = vpop.eup %5202 }
 0x6bb   : > { %v5205_v0 = vpop.eup %5204  ;;  %v1840_v4 = vadd.f32 1.0, %v5203_v11 }
 0x6bc   : > { %v1839_v14 = vadd.f32 1.0, %v5205_v0 }
 0x6bd   : > { %5206 = vrcp.f32 %v1840_v4 }
 0x6be   : > { %5208 = vrcp.f32 %v1839_v14 }
 0x6c7   : > { %v5207_v16 = vpop.eup %5206 }
 0x6c8   : > { %v5209_v18 = vpop.eup %5208  ;;  %4201 = vst.msk [vmem:[%s5770_s10 + $0x38] sm:$0xff] %vm481_vm2, %v5207_v16 }
 0x6c9   : > { %4200 = vst.msk [vmem:[%s5770_s10 + $0x30] sm:$0xff] %vm481_vm2, %v5209_v18  ;;  %2006 = vxpose.xlu1.b32.start [1/2] (short) (narrow) %v5209_v18, 16  ;;  %4656 = vmatprep.mubr.msk.f32.mxu1 %vm481_vm2, %v5209_v18 }
 0x6ca   : > { %4657 = vmatmul.mubr.msk.f32.vlgmr.msra.gmra.mrb[2].mxu1 %vm481_vm2, %v5207_v16 }
 0x6cb   : > { %4957 = vmatpush3.bf16.msra.mxu1 %v5876_v1 }
 0x6cc   : > { %4968 = vmatprep.subr.msk.bf16.mxu1 %vm5704_vm1, %v5962_v19 }
 0x6cd   : > { %2007 = vxpose.xlu1.b32.end [2/2] (short) (narrow) %v5207_v16, 16 }
 0x749   : > { %v2022_v25 = vpop.trf.xlu1 }
 0x74a   : > { %4663 = vmatprep.mubr.msk.f32.mxu1 %vm481_vm2, %v2022_v25 }
 0x74d   : > { %v2023_v27 = vpop.trf.xlu1 }
 0x74e   : > { %4664 = vmatmul.mubr.msk.f32.vlgmr.msra.gmra.mrb[2].mxu1 %vm481_vm2, %v2023_v27 }
 0x74f   : > { %4971 = vmatpush3.bf16.xpose.msk.msra.mxu1 %vm5704_vm1, %v5962_v19  ;;  %4681 = vmatprep.mubr.msk.f32.mxu1 %vm298_vm0, %v2208_v22 }
 0x750   : > { %4981 = vmatprep.subr.bf16.mxu1 %v4980_v24 }
 0x756   : > { %4682 = vmatmul.mubr.msk.f32.vlgmr.msra.gmra.mrb[10].mxu1 %vm298_vm0, %v4676_v21 }
 0x757   : > { %4983 = vmatpush3.bf16.msra.mxu1 %v4980_v24  ;;  %v4805_v24 = vpop.f32.mrb[28].mxu0 }
 0x758   : > { %4985 = vmatprep.subr.bf16.mxu1 %v4984_v31  ;;  %v3573_v25 = vpop.f32.mrb[29].mxu0 }
 0x759   : > { %v5074_v27 = vpack.c.bf16 %v4805_v24, %v3573_v25  ;;  %v4823_v28 = vpop.f32.mrb[30].mxu0 }
 0x75a   : > { %v3746_v30 = vpop.f32.mrb[31].mxu0 }
 0x821   : > { %v4665_v32 = vpop.f32.mrb[2].mxu1 }
 0x822   : > { %2122 = vst.msk [vmem:[%s5975_s13 + $0x8] sm:$0xff] %vm298_vm0, %v4665_v32  ;;  %v2110_v33 = vpop.f32.mrb[3].mxu1 }
 0x823   : > { %2121 = vst.msk [vmem:[%s5975_s13] sm:$0xff] %vm298_vm0, %v2110_v33 }
 0x829   : > { %v4683_v38 = vpop.f32.mrb[10].mxu1 }
 0x82a   : > { %v2304_v39 = vadd.f32 %v4683_v38, %v5982_v34  ;;  %v2298_v40 = vpop.f32.mrb[11].mxu1 }
 0x82b   : > { %v2299_v41 = vadd.f32 %v5985_v35, %v2298_v40 }
 0x82c   : > { %v4219_v42 = vmul.f32 -1.442695, %v2304_v39 }
 0x82d   : > { %v4218_v43 = vmul.f32 -1.442695, %v2299_v41 }
 0x82e   : > { %5210 = vpow2.f32 %v4219_v42 }
 0x82f   : > { %5212 = vpow2.f32 %v4218_v43 }
 0x838   : > { %v5211_v44 = vpop.eup %5210 }
 0x839   : > { %v5213_v45 = vpop.eup %5212  ;;  %v2314_v46 = vadd.f32 1.0, %v5211_v44 }
 0x83a   : > { %v2313_v47 = vadd.f32 1.0, %v5213_v45 }
 0x83b   : > { %5214 = vrcp.f32 %v2314_v46 }
 0x83c   : > { %5216 = vrcp.f32 %v2313_v47 }
 0x845   : > { %v5215_v48 = vpop.eup %5214 }
 0x846   : > { %v5217_v49 = vpop.eup %5216  ;;  %4221 = vst.msk [vmem:[%s5770_s10 + $0x48] sm:$0xff] %vm481_vm2, %v5215_v48 }
 0x847   : > { %4220 = vst.msk [vmem:[%s5770_s10 + $0x40] sm:$0xff] %vm481_vm2, %v5217_v49  ;;  %2397 = vxpose.xlu0.b32.start [1/2] (short) (narrow) %v5217_v49, 16 }
 0x84b   : > { %2398 = vxpose.xlu0.b32.end [2/2] (short) (narrow) %v5215_v48, 16 }
 0x8c7   : > { %v2413_v52 = vpop.trf.xlu0 }
 0x8c8   : > { %4699 = vmatprep.mubr.msk.f32.mxu1 %vm481_vm2, %v2413_v52 }
 0x8cb   : > { %v2414_v53 = vpop.trf.xlu0 }
 0x8cc   : > { %4700 = vmatmul.mubr.msk.f32.vlgmr.msra.gmra.mrb[12].mxu1 %vm481_vm2, %v2414_v53 }
 0x8cd   : > { %4987 = vmatpush3.bf16.msra.mxu1 %v4984_v31  ;;  %4706 = vmatprep.mubr.msk.f32.mxu1 %vm481_vm2, %v5217_v49  ;;  %v5070_v31 = vpack.c.bf16 %v4823_v28, %v3746_v30 }
 0x8ce   : > { %4998 = vmatprep.subr.msk.bf16.mxu1 %vm5704_vm1, %v5962_v19 }
 0x8d4   : > { %4707 = vmatmul.mubr.msk.f32.vlgmr.msra.gmra.mrb[12].mxu1 %vm481_vm2, %v5215_v48 }
 0x8d5   : > { %4724 = vmatprep.mubr.msk.f32.mxu1 %vm298_vm0, %v2665_v5 }
 0x8d6   : > { %5001 = vmatpush3.bf16.xpose.msk.msra.mxu1 %vm5704_vm1, %v5962_v19 }
 0x8d7   : > { %5011 = vmatprep.subr.bf16.mxu1 %v5010_v51 }
 0x8dd   : > { %4725 = vmatmul.mubr.msk.f32.vlgmr.msra.gmra.mrb[14].mxu1 %vm298_vm0, %v4719_v50 }
 0x8de   : > { %5013 = vmatpush3.bf16.msra.mxu1 %v5010_v51 }
 0x8df   : > { %5015 = vmatprep.subr.bf16.mxu1 %v5014_v3 }
 0x9b0   : > { %v4726_v54 = vpop.f32.mrb[14].mxu1 }
 0x9b1   : > { %v2754_v55 = vadd.f32 %v4726_v54, %v5982_v34  ;;  %v2748_v56 = vpop.f32.mrb[15].mxu1 }
 0x9b2   : > { %v2749_v57 = vadd.f32 %v5985_v35, %v2748_v56 }
 0x9b3   : > { %v4237_v58 = vmul.f32 -1.442695, %v2754_v55 }
 0x9b4   : > { %v4236_v60 = vmul.f32 -1.442695, %v2749_v57 }
 0x9b5   : > { %5218 = vpow2.f32 %v4237_v58 }
 0x9b6   : > { %5220 = vpow2.f32 %v4236_v60 }
 0x9bf   : > { %v5219_v62 = vpop.eup %5218 }
 0x9c0   : > { %v5221_v63 = vpop.eup %5220  ;;  %v2764_v1 = vadd.f32 1.0, %v5219_v62 }
 0x9c1   : > { %v2763_v2 = vadd.f32 1.0, %v5221_v63 }
 0x9c2   : > { %5222 = vrcp.f32 %v2764_v1 }
 0x9c3   : > { %5224 = vrcp.f32 %v2763_v2 }
 0x9cc   : > { %v5223_v8 = vpop.eup %5222 }
 0x9cd   : > { %v5225_v9 = vpop.eup %5224  ;;  %4239 = vst.msk [vmem:[%s5770_s10 + $0x58] sm:$0xff] %vm481_vm2, %v5223_v8 }
 0x9ce   : > { %4238 = vst.msk [vmem:[%s5770_s10 + $0x50] sm:$0xff] %vm481_vm2, %v5225_v9  ;;  %2930 = vxpose.xlu1.b32.start [1/2] (short) (narrow) %v5225_v9, 16  ;;  %4742 = vmatprep.mubr.msk.f32.mxu1 %vm481_vm2, %v5225_v9 }
 0x9cf   : > { %4743 = vmatmul.mubr.msk.f32.vlgmr.msra.gmra.mrb[12].mxu1 %vm481_vm2, %v5223_v8 }
 0x9d0   : > { %5017 = vmatpush3.bf16.msra.mxu1 %v5014_v3 }
 0x9d1   : > { %5028 = vmatprep.subr.msk.bf16.mxu1 %vm5704_vm1, %v5962_v19 }
 0x9d2   : > { %2931 = vxpose.xlu1.b32.end [2/2] (short) (narrow) %v5223_v8, 16 }
 0xa4e   : > { %v2946_v26 = vpop.trf.xlu1 }
 0xa4f   : > { %4749 = vmatprep.mubr.msk.f32.mxu1 %vm481_vm2, %v2946_v26 }
 0xa52   : > { %v2947_v29 = vpop.trf.xlu1 }
 0xa53   : > { %4750 = vmatmul.mubr.msk.f32.vlgmr.msra.gmra.mrb[12].mxu1 %vm481_vm2, %v2947_v29 }
 0xa54   : > { %5031 = vmatpush3.bf16.xpose.msk.msra.mxu1 %vm5704_vm1, %v5962_v19  ;;  %4767 = vmatprep.mubr.msk.f32.mxu1 %vm298_vm0, %v3119_v13 }
 0xa55   : > { %5041 = vmatprep.subr.bf16.mxu1 %v5040_v23 }
 0xa5b   : > { %4768 = vmatmul.mubr.msk.f32.vlgmr.msra.gmra.mrb[16].mxu1 %vm298_vm0, %v4762_v12 }
 0xa5c   : > { %5043 = vmatpush3.bf16.msra.mxu1 %v5040_v23 }
 0xa5d   : > { %5045 = vmatprep.subr.bf16.mxu1 %v5044_v15 }
 0xb2e   : > { %v4769_v59 = vpop.f32.mrb[16].mxu1 }
 0xb2f   : > { %v3208_v61 = vadd.f32 %v4769_v59, %v5982_v34  ;;  %v3202_v11 = vpop.f32.mrb[17].mxu1 }
 0xb30   : > { %v3203_v0 = vadd.f32 %v5985_v35, %v3202_v11 }
 0xb31   : > { %v4255_v4 = vmul.f32 -1.442695, %v3208_v61 }
 0xb32   : > { %v4254_v14 = vmul.f32 -1.442695, %v3203_v0 }
 0xb33   : > { %5226 = vpow2.f32 %v4255_v4 }
 0xb34   : > { %5228 = vpow2.f32 %v4254_v14 }
 0xb3d   : > { %v5227_v16 = vpop.eup %5226 }
 0xb3e   : > { %v5229_v18 = vpop.eup %5228  ;;  %v3218_v36 = vadd.f32 1.0, %v5227_v16 }
 0xb3f   : > { %v3217_v37 = vadd.f32 1.0, %v5229_v18 }
 0xb40   : > { %5230 = vrcp.f32 %v3218_v36 }
 0xb41   : > { %5232 = vrcp.f32 %v3217_v37 }
 0xb4a   : > { %v5231_v21 = vpop.eup %5230 }
 0xb4b   : > { %v5233_v22 = vpop.eup %5232  ;;  %4257 = vst.msk [vmem:[%s5770_s10 + $0x68] sm:$0xff] %vm481_vm2, %v5231_v21 }
 0xb4c   : > { %4256 = vst.msk [vmem:[%s5770_s10 + $0x60] sm:$0xff] %vm481_vm2, %v5233_v22  ;;  %3384 = vxpose.xlu0.b32.start [1/2] (short) (narrow) %v5233_v22, 16  ;;  %4785 = vmatprep.mubr.msk.f32.mxu1 %vm481_vm2, %v5233_v22 }
 0xb4d   : > { %4786 = vmatmul.mubr.msk.f32.vlgmr.msra.gmra.mrb[12].mxu1 %vm481_vm2, %v5231_v21 }
 0xb4e   : > { %5047 = vmatpush3.bf16.msra.mxu1 %v5044_v15 }
 0xb4f   : > { %5058 = vmatprep.subr.msk.bf16.mxu1 %vm5704_vm1, %v5962_v19 }
 0xb50   : > { %3385 = vxpose.xlu0.b32.end [2/2] (short) (narrow) %v5231_v21, 16 }
 0xbcc   : > { %v3400_v32 = vpop.trf.xlu0 }
 0xbcd   : > { %4792 = vmatprep.mubr.msk.f32.mxu1 %vm481_vm2, %v3400_v32 }
 0xbd0   : > { %v3401_v33 = vpop.trf.xlu0 }
 0xbd1   : > { %4793 = vmatmul.mubr.msk.f32.vlgmr.msra.gmra.mrb[12].mxu1 %vm481_vm2, %v3401_v33 }
 0xbd2   : > { %5061 = vmatpush3.bf16.xpose.msk.msra.mxu1 %vm5704_vm1, %v5962_v19  ;;  %4810 = vmatprep.mubr.msk.f32.mxu1 %vm298_vm0, %v3573_v25 }
 0xbd3   : > { %5071 = vmatprep.subr.bf16.mxu1 %v5070_v31 }
 0xbd9   : > { %4811 = vmatmul.mubr.msk.f32.vlgmr.msra.gmra.mrb[18].mxu1 %vm298_vm0, %v4805_v24 }
 0xbda   : > { %5073 = vmatpush3.bf16.msra.mxu1 %v5070_v31 }
 0xbdb   : > { %5075 = vmatprep.subr.bf16.mxu1 %v5074_v27 }
 0xcac   : > { %v4812_v38 = vpop.f32.mrb[18].mxu1 }
 0xcad   : > { %v3662_v39 = vadd.f32 %v4812_v38, %v5982_v34  ;;  %v3656_v40 = vpop.f32.mrb[19].mxu1 }
 0xcae   : > { %v3657_v41 = vadd.f32 %v5985_v35, %v3656_v40 }
 0xcaf   : > { %v4273_v42 = vmul.f32 -1.442695, %v3662_v39 }
 0xcb0   : > { %v4272_v43 = vmul.f32 -1.442695, %v3657_v41 }
 0xcb1   : > { %5234 = vpow2.f32 %v4273_v42 }
 0xcb2   : > { %5236 = vpow2.f32 %v4272_v43 }
 0xcbb   : > { %v5235_v10 = vpop.eup %5234 }
 0xcbc   : > { %v5237_v19 = vpop.eup %5236  ;;  %v3672_v44 = vadd.f32 1.0, %v5235_v10 }
 0xcbd   : > { %v3671_v45 = vadd.f32 1.0, %v5237_v19 }
 0xcbe   : > { %5238 = vrcp.f32 %v3672_v44 }
 0xcbf   : > { %5240 = vrcp.f32 %v3671_v45 }
 0xcc8   : > { %v5239_v46 = vpop.eup %5238 }
 0xcc9   : > { %v5241_v47 = vpop.eup %5240  ;;  %4275 = vst.msk [vmem:[%s5770_s10 + $0x78] sm:$0xff] %vm481_vm2, %v5239_v46 }
 0xcca   : > { %4274 = vst.msk [vmem:[%s5770_s10 + $0x70] sm:$0xff] %vm481_vm2, %v5241_v47  ;;  %3838 = vxpose.xlu1.b32.start [1/2] (short) (narrow) %v5241_v47, 16  ;;  %4828 = vmatprep.mubr.msk.f32.mxu1 %vm481_vm2, %v5241_v47 }
 0xccb   : > { %4829 = vmatmul.mubr.msk.f32.vlgmr.msra.gmra.mrb[12].mxu1 %vm481_vm2, %v5239_v46 }
 0xccc   : > { %5077 = vmatpush3.bf16.msra.mxu1 %v5074_v27 }
 0xcce   : > { %3839 = vxpose.xlu1.b32.end [2/2] (short) (narrow) %v5239_v46, 16 }
 0xd4a   : > { %v3854_v34 = vpop.trf.xlu1 }
 0xd4b   : > { %4835 = vmatprep.mubr.msk.f32.mxu1 %vm481_vm2, %v3854_v34 }
 0xd4e   : > { %v3855_v35 = vpop.trf.xlu1 }
 0xd4f   : > { %4836 = vmatmul.mubr.msk.f32.vlgmr.msra.gmra.mrb[12].mxu1 %vm481_vm2, %v3855_v35 }
 0xd50   : > { %5343 = shalt.err (!%p5340_p10)
}
 0xd51   : > { %s5344_s21 = scalar_lea.hbm %s6056_s30, 2048  ;;  %s5348_s27 = scalar_lea.hbm %s6149_s4, 4096 }
 0xd52   : > { %p5345_p8 = scmp.ne.s32.totalorder %s6056_s30, %s5344_s21  ;;  %p5349_p0 = scmp.lt.u32.totalorder %s6056_s30, %s6149_s4 }
 0xd53   : > { %p5350_p9 = scmp.lt.u32.totalorder %s5348_s27, %s5344_s21  ;;  %p5352_p6 = scmp.lt.u32.totalorder %s5344_s21, %s6056_s30 }
 0xd54   : > { %p5346_p7 = pnand %p5345_p8, %p6168_p1 }
 0xd55   : > { %p5351_p12 = por %p5350_p9, %p5349_p0 }
 0xd56   : > { %p5347_p3 = pneg %p5346_p7 }
 0xd57   : > { %p5353_p11 = por %p5352_p6, %p5351_p12 }
 0xd59   : > { %p5354_p13 = pnand %p5353_p11, %p5347_p3 }
 0xd5b   : > { %5357 = shalt.err (!%p5354_p13)
}
 0xd5c   : > { %s5444_s11 = smov 128   ;;  %s5445_s7 = smov 8  }
 0xd5d   : > { %5115 = dma.vmem_to_hbm [thread:$0]  (%p6168_p1), %s6058_s5, 2048, %s6056_s30, %s3962_s12, %s5444_s11, %s5444_s11, %s5445_s7  }
 0xd5e   : > { %s3976_s14 = sshll.u32 %s5975_s13, 4  ;;  %s4299_s26 = sshll.u32 %s5561_s8, 9  ;;  %s6089_s14 = int_to_ptr.vmem [resolvable:$true] %s3976_s14 }
 0xd5f   : > { %s6094_s21 = scalar_lea.hbm %s6148_s3, %s4299_s26  ;;  %s3957_s9 = scalar_lea.sflag [#allocation4], %s5664_s28 }
 0xd60   : > { %s5358_s5 = scalar_lea.vmem %s6089_s14, 512  ;;  %s5446_s8 = smov [#allocation8]  }
 0xd61   : > { %p5359_p4 = scmp.ne.s32.totalorder %s6089_s14, %s5358_s5  ;;  %s5362_s30 = sshll.u32 %s5446_s8, 4  ;;  %s5363_s30 = int_to_ptr.vmem [resolvable:$false] %s5362_s30 }
 0xd62   : > { %s5364_s12 = scalar_lea.vmem %s5363_s30, 1024  ;;  %p5365_p10 = scmp.lt.s32.totalorder %s6089_s14, %s5363_s30 }
 0xd63   : > { %p5360_p2 = pnand %p5359_p4, %p6168_p1  ;;  %p5366_p8 = scmp.lt.s32.totalorder %s5364_s12, %s5358_s5 }
 0xd65   : > { %p5361_p5 = pneg %p5360_p2  ;;  %p5367_p7 = por %p5366_p8, %p5365_p10 }
 0xd67   : > { %p5368_p3 = pnand %p5367_p7, %p5361_p5 }
 0xe22   : > { %v4837_v48 = vpop.f32.mrb[12].mxu1 }
 0xe23   : > { %4283 = vst.msk [vmem:[%s5975_s13 + $0x18] sm:$0xff] %vm298_vm0, %v4837_v48  ;;  %v3942_v49 = vpop.f32.mrb[13].mxu1 }
 0xe24   : > { %4282 = vst.msk [vmem:[%s5975_s13 + $0x10] sm:$0xff] %vm298_vm0, %v3942_v49 }
 0xe25   : > { %5371 = shalt.err (!%p5368_p3)
}
 0xe26   : > { %s5372_s13 = scalar_lea.hbm %s6094_s21, 512  ;;  %s5376_s10 = scalar_lea.hbm %s6148_s3, 1024 }
 0xe27   : > { %p5373_p0 = scmp.ne.s32.totalorder %s6094_s21, %s5372_s13  ;;  %p5377_p6 = scmp.lt.u32.totalorder %s6094_s21, %s6148_s3 }
 0xe28   : > { %p5378_p11 = scmp.lt.u32.totalorder %s5376_s10, %s5372_s13  ;;  %p5380_p4 = scmp.lt.u32.totalorder %s5372_s13, %s6094_s21 }
 0xe29   : > { %p5374_p9 = pnand %p5373_p0, %p6168_p1 }
 0xe2a   : > { %p5379_p13 = por %p5378_p11, %p5377_p6 }
 0xe2b   : > { %p5375_p12 = pneg %p5374_p9 }
 0xe2c   : > { %p5381_p2 = por %p5380_p4, %p5379_p13 }
 0xe2e   : > { %p5382_p5 = pnand %p5381_p2, %p5375_p12 }
 0xe30   : > { %5385 = shalt.err (!%p5382_p5)
}
 0xe31   : > { %5114 = dma.vmem_to_hbm [thread:$0]  (%p6168_p1), %s6089_s14, 512, %s6094_s21, %s3957_s9, %s5444_s11, %s5444_s11, %s5445_s7  }
 0xe32 PF: > { %s4008_s23 = sand.u32 1, %s5424_s15   ;;  %p6169_p10 = scmp.ne.s32.totalorder %s6157_s29, 0 }
 0xe33   : > { %p6170_p8 = scmp.ge.s32.totalorder %s5436_s18, 2  ;;  %s4009_s6 = scalar_lea.sflag [#allocation4], %s4008_s23 }
 0xe35   : > { %p5130_p7 = pnand %p6170_p8, %p6169_p10 }
 0xe37   : > { %5415 = dma.done.wait (!%p5130_p7), %s4009_s6, 512  }
 0xe38   : > { %5417 = vsyncadd (!%p5130_p7), %s4009_s6, 4294966784  ;;  %s4018_s25 = scalar_lea.sflag [#allocation10], %s4008_s23 }
 0xe39   : > { %5419 = dma.done.wait (!%p5130_p7), %s4018_s25, 2048  }
 0xe3a   : > { %5421 = vsyncadd (!%p5130_p7), %s4018_s25, 4294965248  ;;  %p22_p1 = scmp.ge.s32.totalorder %s5493_s19, 4   ;;  %s6171_s15 = smov %s5428_s16 }
 0xe3b   : > { %s6172_s16 = smov %s5432_s17  ;;  %s6173_s17 = smov %s5502_s22 }
 0xe3c   : > { %s6174_s18 = smov %s5493_s19  ;;  %24 = sbr.rel (!%p22_p1) target bundleno = 8 (0x8), region = 126 }
 0xe43   :  { %4023 = vsyncpa [#allocation3], 1 }
 0xe44   :  { %4025 = vsyncpa [#allocation3 + $0x1], 1 }
 0xe45   :  { %4026 = vsyncpa [#allocation6], 1 }
 0xe46   :  { %4027 = vsyncpa [#allocation4], 1 }
 0xe47   :  { %4029 = vsyncpa [#allocation4 + $0x1], 1 }
 0xe48   :  { %4030 = vsyncpa [#allocation10], 1 }
 0xe49   :  { %4032 = vsyncpa [#allocation10 + $0x1], 1 }

</bundles_post_ra>
